<compile_context>
chip_gen: v7x
topology: tpu7x:2x2x1
jax: 0.10.0
libtpu: 0.0.40
codegen_flags: <defaults>
</compile_context>

<pallas_src>
import functools

import numpy as np
import jax
import jax.numpy as jnp
from jax.experimental import pallas as pl
from jax.experimental.pallas import tpu as pltpu

EPS = 1e-5                       # PyTorch LayerNorm default
VMEM_BUDGET = 48 * 1024 * 1024   # per-kernel VMEM budget; < v7x 64 MiB physical


def _layernorm(x, gamma, beta):
    mean = jnp.mean(x, axis=-1, keepdims=True)
    var = jnp.mean(jnp.square(x - mean), axis=-1, keepdims=True)
    return (x - mean) * jax.lax.rsqrt(var + EPS) * gamma + beta


def _round_up(n, m):
    return ((n + m - 1) // m) * m


def _pick_row_tile(N, per_row_bytes, fixed_bytes, budget, target=512):
    """Largest multiple-of-8 divisor of N, <= target, whose VMEM estimate fits the budget."""
    if N <= 8:
        return N
    cands = sorted((rt for rt in range(8, min(N, target) + 1, 8) if N % rt == 0),
                   reverse=True)
    for rt in cands:
        if fixed_bytes + rt * per_row_bytes <= budget:
            return rt
    return cands[-1] if cands else N


def _pick_time_chunk(T, Bs, E, gx_item, whh_item, budget):
    """Largest divisor-of-T chunk whose gx/h blocks are lane-aligned and fit the VMEM budget."""
    G = 4 * E
    divisors = sorted((d for d in range(1, T + 1) if T % d == 0), reverse=True)

    def need(ct):
        return (2 * (Bs * ct * G * gx_item + Bs * ct * E * 4)   # gx in + h out (double-buffered)
                + 2 * E * G * whh_item                          # Whh block (double-buffered)
                + 2 * Bs * E * 4)                               # h/c scratch

    def lane_ok(ct):
        return ct == T or ((ct * E) % 128 == 0 and (ct * G) % 128 == 0)

    for ct in divisors:
        if lane_ok(ct) and need(ct) <= budget:
            return ct
    for ct in divisors:
        if lane_ok(ct):
            return ct
    return T


def _pick_hidden_tile(G, E, rt_guess, w_item, budget):
    """FFN hidden(4E) tile: multiple of 128 (or G itself) whose weight slabs fit half the budget."""
    cands = sorted({G} | {kh for kh in range(128, G, 128) if G % kh == 0}, reverse=True)
    for kh in cands:
        need = 2 * (E * kh * w_item + kh * E * w_item + kh * 4) + rt_guess * kh * 4
        if need <= budget // 2:
            return kh
    return cands[-1]


# ---------- Kernel A: LayerNorm(l1) + x-projection for all timesteps (parallel) ----------
def gates_x_kernel(x_ref, g1_ref, b1_ref, wih_ref, bias_ref, gx_ref):
    xn = _layernorm(x_ref[...].astype(jnp.float32), g1_ref[...], b1_ref[...])
    acc = jnp.dot(xn.astype(wih_ref.dtype), wih_ref[...], preferred_element_type=jnp.float32)
    gx_ref[...] = (acc + bias_ref[...]).astype(gx_ref.dtype)


# ---------- Kernel B: LSTM recurrence only (h @ Whh + elementwise), time-chunked ----------
def lstm_recurrence_kernel(gx_ref, whh_ref, h_seq_ref, h_scr, c_scr, *, E, CT):
    tc = pl.program_id(1)
    G = 4 * E

    @pl.when(tc == 0)
    def _():
        h_scr[...] = jnp.zeros_like(h_scr)
        c_scr[...] = jnp.zeros_like(c_scr)

    whh = whh_ref[...]
    h = h_scr[...]
    c = c_scr[...]
    hs = []
    for i in range(CT):  # static unrolled loop -> all ref slices are static
        gates = gx_ref[:, i * G:(i + 1) * G].astype(jnp.float32) + jnp.dot(
            h.astype(whh.dtype), whh, preferred_element_type=jnp.float32)   # (Bs, 4E)
        s = jax.nn.sigmoid(gates)            # one full-width sigmoid pass
        i_g = s[:, 0 * E:1 * E]
        f_g = s[:, 1 * E:2 * E]
        g_g = 2.0 * s[:, 2 * E:3 * E] - 1.0  # tanh via pre-scaled sigmoid (exact)
        o_g = s[:, 3 * E:4 * E]
        c = f_g * c + i_g * g_g
        h = o_g * jnp.tanh(c)
        hs.append(h)
    # Lane-dense store: one full (Bs, CT*E) block per grid step instead of CT masked stores.
    h_seq_ref[...] = jnp.concatenate(hs, axis=-1) if CT > 1 else hs[0]
    h_scr[...] = h
    c_scr[...] = c


# ---------- Kernel C: residual1 + LayerNorm(l2) + FFN (hidden streamed) + residual2 ----------
def ffn_kernel(x_ref, h_ref, g2_ref, b2_ref, w1_ref, bb1_ref, w2_ref, bb2_ref, out_ref,
               y_scr, yn_scr, acc_scr):
    k = pl.program_id(1)

    @pl.when(k == 0)
    def _():
        y = x_ref[...].astype(jnp.float32) + h_ref[...]        # residual 1 (dropout = identity)
        y_scr[...] = y
        yn_scr[...] = _layernorm(y, g2_ref[...], b2_ref[...]).astype(yn_scr.dtype)
        acc_scr[...] = jnp.zeros_like(acc_scr)

    hdn = jnp.maximum(
        jnp.dot(yn_scr[...], w1_ref[...], preferred_element_type=jnp.float32)
        + bb1_ref[...], 0.0)
    acc_scr[...] += jnp.dot(hdn.astype(w2_ref.dtype), w2_ref[...],
                            preferred_element_type=jnp.float32)

    @pl.when(k == pl.num_programs(1) - 1)
    def _():
        out_ref[...] = (y_scr[...] + acc_scr[...] + bb2_ref[...]).astype(out_ref.dtype)


def lstm_block_forward(x, p, *, matmul_dtype=jnp.bfloat16, recurrence_dtype=jnp.float32,
                       vmem_budget=VMEM_BUDGET):
    B, T_in, E = x.shape
    G = 4 * E

    # Pad T so N = B*T is a multiple of 8 (keeps row tiling off the full-array fallback path).
    # Padded (zero) timesteps come after the real ones, so the causal recurrence is unaffected.
    T = T_in if (B * T_in) % 8 == 0 else _round_up(T_in, 8)
    if T != T_in:
        x = jnp.pad(x, ((0, 0), (0, T - T_in), (0, 0)))
    N = B * T

    w_item = np.dtype(matmul_dtype).itemsize
    whh_item = np.dtype(recurrence_dtype).itemsize
    gx_dtype = matmul_dtype          # bf16 gx halves the (N,4E) HBM roundtrip into Kernel B
    gx_item = np.dtype(gx_dtype).itemsize
    out_item = np.dtype(x.dtype).itemsize

    # Pre-scale the "g" gate columns by 2 (i|f|g|o PyTorch order) -> single sigmoid pass in-kernel.
    col_scale = jnp.concatenate([jnp.ones((2 * E,), jnp.float32),
                                 jnp.full((E,), 2.0, jnp.float32),
                                 jnp.ones((E,), jnp.float32)])
    wih_t = (p["w_ih"].T * col_scale[None, :]).astype(matmul_dtype)      # (E, 4E) bf16 for MXU
    whh_t = (p["w_hh"].T * col_scale[None, :]).astype(recurrence_dtype)  # (E, 4E) f32: no compounding
    bias = ((p["b_ih"] + p["b_hh"]) * col_scale).reshape(1, G).astype(jnp.float32)
    w1_t = p["w1"].T.astype(matmul_dtype)                                # (E, 4E)
    w2_t = p["w2"].T.astype(matmul_dtype)                                # (4E, E)

    x2 = x.reshape(N, E)  # free row-major reshape; NO transpose

    # NOTE: invariant-index blocks (weights/biases) are not re-DMA'd across grid steps by the
    # pipeline; their 2x buffer footprint is accounted for in the VMEM budget calculations.

    # ---------------- Kernel A ----------------
    per_row_a = 2 * (E * 4 + G * gx_item)
    fixed_a = 2 * (E * G * w_item + G * 4 + 2 * E * 4)
    RTa = _pick_row_tile(N, per_row_a, fixed_a, vmem_budget)
    gx2 = pl.pallas_call(
        gates_x_kernel,
        out_shape=jax.ShapeDtypeStruct((N, G), gx_dtype),
        grid_spec=pltpu.PrefetchScalarGridSpec(
            num_scalar_prefetch=0,
            grid=(N // RTa,),
            in_specs=[
                pl.BlockSpec((RTa, E), lambda r: (r, 0)),
                pl.BlockSpec((1, E), lambda r: (0, 0)),
                pl.BlockSpec((1, E), lambda r: (0, 0)),
                pl.BlockSpec((E, G), lambda r: (0, 0)),
                pl.BlockSpec((1, G), lambda r: (0, 0)),
            ],
            out_specs=pl.BlockSpec((RTa, G), lambda r: (r, 0)),
        ),
        compiler_params=pltpu.CompilerParams(
            dimension_semantics=("parallel",), vmem_limit_bytes=vmem_budget),
        cost_estimate=pl.CostEstimate(
            flops=2 * N * E * G, transcendentals=0,
            bytes_accessed=N * E * 4 + N * G * gx_item + E * G * w_item),
    )(x2, p["g1"].reshape(1, E), p["be1"].reshape(1, E), wih_t, bias)

    # ---------------- Kernel B ----------------
    # Batch sharding across TensorCores (v7x): only split when each shard keeps >= 8 sublanes.
    NB = 2 if (B % 2 == 0 and (B // 2) % 8 == 0) else 1
    Bs = B // NB
    CT = _pick_time_chunk(T, Bs, E, gx_item, whh_item, vmem_budget)
    gx_flat = gx2.reshape(B, T * G)  # free reshape (rows stay b-major: b*T + t)
    h_flat = pl.pallas_call(
        functools.partial(lstm_recurrence_kernel, E=E, CT=CT),
        out_shape=jax.ShapeDtypeStruct((B, T * E), jnp.float32),
        grid_spec=pltpu.PrefetchScalarGridSpec(
            num_scalar_prefetch=0,
            grid=(NB, T // CT),
            in_specs=[
                pl.BlockSpec((Bs, CT * G), lambda nb, tc: (nb, tc)),
                pl.BlockSpec((E, G), lambda nb, tc: (0, 0)),
            ],
            out_specs=pl.BlockSpec((Bs, CT * E), lambda nb, tc: (nb, tc)),
            scratch_shapes=[pltpu.VMEM((Bs, E), jnp.float32),
                            pltpu.VMEM((Bs, E), jnp.float32)],
        ),
        compiler_params=pltpu.CompilerParams(
            dimension_semantics=("parallel", "arbitrary"), vmem_limit_bytes=vmem_budget),
        cost_estimate=pl.CostEstimate(
            flops=2 * B * T * E * G, transcendentals=B * T * (G + E),
            bytes_accessed=B * T * G * gx_item + E * G * whh_item + B * T * E * 4),
    )(gx_flat, whh_t)

    # ---------------- Kernel C ----------------
    KH = _pick_hidden_tile(G, E, 512, w_item, vmem_budget)
    KT = G // KH
    per_row_c = 2 * (2 * E * 4 + E * out_item) + (E * 4 + E * w_item + E * 4) + KH * 4
    fixed_c = 2 * (E * KH * w_item + KH * E * w_item + KH * 4 + 3 * E * 4)
    RTc = _pick_row_tile(N, per_row_c, fixed_c, vmem_budget)
    h2 = h_flat.reshape(N, E)  # free reshape; same b-major row order as x2
    out2 = pl.pallas_call(
        ffn_kernel,
        out_shape=jax.ShapeDtypeStruct((N, E), x.dtype),
        grid_spec=pltpu.PrefetchScalarGridSpec(
            num_scalar_prefetch=0,
            grid=(N // RTc, KT),
            in_specs=[
                pl.BlockSpec((RTc, E), lambda r, k: (r, 0)),
                pl.BlockSpec((RTc, E), lambda r, k: (r, 0)),
                pl.BlockSpec((1, E), lambda r, k: (0, 0)),
                pl.BlockSpec((1, E), lambda r, k: (0, 0)),
                pl.BlockSpec((E, KH), lambda r, k: (0, k)),
                pl.BlockSpec((1, KH), lambda r, k: (0, k)),
                pl.BlockSpec((KH, E), lambda r, k: (k, 0)),
                pl.BlockSpec((1, E), lambda r, k: (0, 0)),
            ],
            out_specs=pl.BlockSpec((RTc, E), lambda r, k: (r, 0)),
            scratch_shapes=[pltpu.VMEM((RTc, E), jnp.float32),   # y   (residual-1 result)
                            pltpu.VMEM((RTc, E), matmul_dtype),  # LN2(y) in MXU dtype
                            pltpu.VMEM((RTc, E), jnp.float32)],  # FFN accumulator
        ),
        compiler_params=pltpu.CompilerParams(
            dimension_semantics=("parallel", "arbitrary"), vmem_limit_bytes=vmem_budget),
        cost_estimate=pl.CostEstimate(
            flops=4 * N * E * G, transcendentals=0,
            bytes_accessed=3 * N * E * 4 + 2 * E * G * w_item),
    )(x2, h2, p["g2"].reshape(1, E), p["be2"].reshape(1, E),
      w1_t, p["bb1"].reshape(1, G), w2_t, p["bb2"].reshape(1, E))

    out = out2.reshape(B, T, E)
    if T != T_in:
        out = out[:, :T_in, :]
    return out


# ---------------- pure-JAX reference (mirrors PyTorch semantics in eval mode) ----------------
def reference_forward(x, p):
    B, T, E = x.shape

    def ln(v, g, b):
        m = v.mean(-1, keepdims=True)
        var = ((v - m) ** 2).mean(-1, keepdims=True)
        return (v - m) / jnp.sqrt(var + EPS) * g + b

    xn = ln(x, p["g1"], p["be1"])
    h = jnp.zeros((B, E), jnp.float32)
    c = jnp.zeros((B, E), jnp.float32)
    hs = []
    for t in range(T):
        gates = xn[:, t] @ p["w_ih"].T + p["b_ih"] + h @ p["w_hh"].T + p["b_hh"]
        i, f, g, o = jnp.split(gates, 4, axis=-1)
        i, f, g, o = jax.nn.sigmoid(i), jax.nn.sigmoid(f), jnp.tanh(g), jax.nn.sigmoid(o)
        c = f * c + i * g
        h = o * jnp.tanh(c)
        hs.append(h)
    y1 = x + jnp.stack(hs, axis=1)
    yn = ln(y1, p["g2"], p["be2"])
    ff = jnp.maximum(yn @ p["w1"].T + p["bb1"], 0.0) @ p["w2"].T + p["bb2"]
    return y1 + ff


def init_params(key, E):
    ks = jax.random.split(key, 8)
    s = 1.0 / np.sqrt(E)
    s1 = 1.0 / np.sqrt(E)          # linear1 fan_in = E
    s2 = 1.0 / np.sqrt(4 * E)      # linear2 fan_in = 4E
    u = lambda k, shp, sc: jax.random.uniform(k, shp, jnp.float32, -sc, sc)
    return {
        "w_ih": u(ks[0], (4 * E, E), s),
        "w_hh": u(ks[1], (4 * E, E), s),
        "b_ih": u(ks[2], (4 * E,), s),
        "b_hh": u(ks[3], (4 * E,), s),
        "w1": u(ks[4], (4 * E, E), s1),
        "bb1": u(ks[5], (4 * E,), s1),
        "w2": u(ks[6], (E, 4 * E), s2),
        "bb2": u(ks[7], (E,), s2),
        "g1": jnp.ones((E,), jnp.float32),
        "be1": jnp.zeros((E,), jnp.float32),
        "g2": jnp.ones((E,), jnp.float32),
        "be2": jnp.zeros((E,), jnp.float32),
    }


if __name__ == "__main__":
    B, T, E = 2, 8, 32
    key = jax.random.PRNGKey(0)
    kx, kp = jax.random.split(key)
    x = jax.random.normal(kx, (B, T, E), jnp.float32)
    params = init_params(kp, E)

    ref = jax.block_until_ready(reference_forward(x, params))

    # Exact path: all matmuls in f32 -> must match the PyTorch-equivalent reference to 1e-4.
    out_f32 = jax.block_until_ready(
        jax.jit(functools.partial(lstm_block_forward, matmul_dtype=jnp.float32))(x, params))
    np.testing.assert_allclose(np.asarray(out_f32), np.asarray(ref), rtol=1e-4, atol=1e-4)

    # Fast path (default): bf16 MXU operands + bf16 gx storage, f32 accumulation, f32 recurrence.
    out_bf16 = jax.block_until_ready(jax.jit(lstm_block_forward)(x, params))
    np.testing.assert_allclose(np.asarray(out_bf16), np.asarray(ref), rtol=5e-2, atol=5e-2)

    print("KERNEL_OK")
</pallas_src>

<mosaic_0001>
module attributes {stable_mosaic.version = 11 : i64} {
  func.func @gates_x_kernel(%arg0: i32, %arg1: memref<16x32xf32, #tpu.memory_space<vmem>>, %arg2: memref<1x32xf32, #tpu.memory_space<vmem>>, %arg3: memref<1x32xf32, #tpu.memory_space<vmem>>, %arg4: memref<32x128xf32, #tpu.memory_space<vmem>>, %arg5: memref<1x128xf32, #tpu.memory_space<vmem>>, %arg6: memref<16x128xf32, #tpu.memory_space<vmem>>) attributes {dimension_semantics = [#tpu.dimension_semantics<parallel>], iteration_bounds = array<i64: 1>, scalar_prefetch = 0 : i64, scratch_operands = 0 : i64, tpu.core_type = #tpu.core_type<tc>, window_params = [{transform_indices = @transform_0, window_bounds = array<i64: 16, 32>}, {pipeline_mode = #tpu.pipeline_mode<synchronous>, transform_indices = @transform_1, window_bounds = array<i64: 1, 32>}, {pipeline_mode = #tpu.pipeline_mode<synchronous>, transform_indices = @transform_2, window_bounds = array<i64: 1, 32>}, {pipeline_mode = #tpu.pipeline_mode<synchronous>, transform_indices = @transform_3, window_bounds = array<i64: 32, 128>}, {pipeline_mode = #tpu.pipeline_mode<synchronous>, transform_indices = @transform_4, window_bounds = array<i64: 1, 128>}, {transform_indices = @transform_5, window_bounds = array<i64: 16, 128>}]} {
    %c0 = arith.constant 0 : index
    %c0_0 = arith.constant 0 : index
    %0 = vector.load %arg1[%c0, %c0_0] : memref<16x32xf32, #tpu.memory_space<vmem>>, vector<16x32xf32>
    %c0_1 = arith.constant 0 : index
    %c0_2 = arith.constant 0 : index
    %1 = vector.load %arg2[%c0_1, %c0_2] : memref<1x32xf32, #tpu.memory_space<vmem>>, vector<1x32xf32>
    %c0_3 = arith.constant 0 : index
    %c0_4 = arith.constant 0 : index
    %2 = vector.load %arg3[%c0_3, %c0_4] : memref<1x32xf32, #tpu.memory_space<vmem>>, vector<1x32xf32>
    %cst = arith.constant dense<0.000000e+00> : vector<16xf32>
    %3 = vector.multi_reduction <add>, %0, %cst [1] : vector<16x32xf32> to vector<16xf32>
    %4 = vector.shape_cast %3 : vector<16xf32> to vector<16x1xf32>
    %cst_5 = arith.constant 3.200000e+01 : f32
    %5 = vector.broadcast %cst_5 : f32 to vector<16x1xf32>
    %6 = arith.divf %4, %5 : vector<16x1xf32>
    %7 = vector.broadcast %6 : vector<16x1xf32> to vector<16x32xf32>
    %8 = arith.subf %0, %7 : vector<16x32xf32>
    %9 = arith.mulf %8, %8 : vector<16x32xf32>
    %cst_6 = arith.constant dense<0.000000e+00> : vector<16xf32>
    %10 = vector.multi_reduction <add>, %9, %cst_6 [1] : vector<16x32xf32> to vector<16xf32>
    %11 = vector.shape_cast %10 : vector<16xf32> to vector<16x1xf32>
    %cst_7 = arith.constant 3.200000e+01 : f32
    %12 = vector.broadcast %cst_7 : f32 to vector<16x1xf32>
    %13 = arith.divf %11, %12 : vector<16x1xf32>
    %14 = vector.broadcast %6 : vector<16x1xf32> to vector<16x32xf32>
    %15 = arith.subf %0, %14 : vector<16x32xf32>
    %cst_8 = arith.constant 9.99999974E-6 : f32
    %16 = vector.broadcast %cst_8 : f32 to vector<16x1xf32>
    %17 = arith.addf %13, %16 : vector<16x1xf32>
    %18 = math.rsqrt %17 : vector<16x1xf32>
    %19 = vector.broadcast %18 : vector<16x1xf32> to vector<16x32xf32>
    %20 = arith.mulf %15, %19 : vector<16x32xf32>
    %21 = vector.broadcast %1 : vector<1x32xf32> to vector<16x32xf32>
    %22 = arith.mulf %20, %21 : vector<16x32xf32>
    %23 = vector.broadcast %2 : vector<1x32xf32> to vector<16x32xf32>
    %24 = arith.addf %22, %23 : vector<16x32xf32>
    %c0_9 = arith.constant 0 : index
    %c0_10 = arith.constant 0 : index
    %25 = vector.load %arg4[%c0_9, %c0_10] : memref<32x128xf32, #tpu.memory_space<vmem>>, vector<32x128xf32>
    %cst_11 = arith.constant dense<0.000000e+00> : vector<16x128xf32>
    %26 = tpu.matmul %24, %25, %cst_11 {dimension_numbers = #tpu.dot_dimension_numbers<[1], [0], [0], [1], [0, 0, 1, 1], [], []>} : vector<16x32xf32>, vector<32x128xf32>, vector<16x128xf32> -> vector<16x128xf32>
    %c0_12 = arith.constant 0 : index
    %c0_13 = arith.constant 0 : index
    %27 = vector.load %arg5[%c0_12, %c0_13] : memref<1x128xf32, #tpu.memory_space<vmem>>, vector<1x128xf32>
    %28 = vector.broadcast %27 : vector<1x128xf32> to vector<16x128xf32>
    %29 = arith.addf %26, %28 : vector<16x128xf32>
    %c0_14 = arith.constant 0 : index
    %c0_15 = arith.constant 0 : index
    %30 = vector.load %arg6[%c0_14, %c0_15] : memref<16x128xf32, #tpu.memory_space<vmem>>, vector<16x128xf32>
    tpu.vector_store %arg6[%c0_14, %c0_15], %29 {strides = array<i32>} : memref<16x128xf32, #tpu.memory_space<vmem>>, vector<16x128xf32>,
    return
  }
  func.func @transform_0(%arg0: i32) -> (i32, i32) {
    %c0_i32 = arith.constant 0 : i32
    %c0_i32_0 = arith.constant 0 : i32
    return %arg0, %c0_i32 : i32, i32
  }
  func.func @transform_1(%arg0: i32) -> (i32, i32) {
    %c0_i32 = arith.constant 0 : i32
    %c0_i32_0 = arith.constant 0 : i32
    %c0_i32_1 = arith.constant 0 : i32
    return %c0_i32, %c0_i32_0 : i32, i32
  }
  func.func @transform_2(%arg0: i32) -> (i32, i32) {
    %c0_i32 = arith.constant 0 : i32
    %c0_i32_0 = arith.constant 0 : i32
    %c0_i32_1 = arith.constant 0 : i32
    return %c0_i32, %c0_i32_0 : i32, i32
  }
  func.func @transform_3(%arg0: i32) -> (i32, i32) {
    %c0_i32 = arith.constant 0 : i32
    %c0_i32_0 = arith.constant 0 : i32
    %c0_i32_1 = arith.constant 0 : i32
    return %c0_i32, %c0_i32_0 : i32, i32
  }
  func.func @transform_4(%arg0: i32) -> (i32, i32) {
    %c0_i32 = arith.constant 0 : i32
    %c0_i32_0 = arith.constant 0 : i32
    %c0_i32_1 = arith.constant 0 : i32
    return %c0_i32, %c0_i32_0 : i32, i32
  }
  func.func @transform_5(%arg0: i32) -> (i32, i32) {
    %c0_i32 = arith.constant 0 : i32
    %c0_i32_0 = arith.constant 0 : i32
    return %arg0, %c0_i32 : i32, i32
  }
}

module attributes {stable_mosaic.version = 11 : i64} {
  func.func @lstm_recurrence_kernel(%arg0: i32, %arg1: i32, %arg2: memref<2x1024xf32, #tpu.memory_space<vmem>>, %arg3: memref<32x128xf32, #tpu.memory_space<vmem>>, %arg4: memref<2x256xf32, #tpu.memory_space<vmem>>, %arg5: memref<2x32xf32, #tpu.memory_space<vmem>>, %arg6: memref<2x32xf32, #tpu.memory_space<vmem>>) attributes {dimension_semantics = [#tpu.dimension_semantics<parallel>, #tpu.dimension_semantics<arbitrary>], iteration_bounds = array<i64: 1, 1>, scalar_prefetch = 0 : i64, scratch_operands = 2 : i64, tpu.core_type = #tpu.core_type<tc>, window_params = [{transform_indices = @transform_0, window_bounds = array<i64: 2, 1024>}, {pipeline_mode = #tpu.pipeline_mode<synchronous>, transform_indices = @transform_1, window_bounds = array<i64: 32, 128>}, {transform_indices = @transform_2, window_bounds = array<i64: 2, 256>}]} {
    %c0_i32 = arith.constant 0 : i32
    %0 = arith.cmpi eq, %arg1, %c0_i32 : i32
    %1 = arith.extui %0 : i1 to i32
    %c0_i32_0 = arith.constant 0 : i32
    %2 = arith.cmpi ne, %1, %c0_i32_0 : i32
    scf.if %2 {
      %cst_52 = arith.constant 0.000000e+00 : f32
      %178 = vector.broadcast %cst_52 : f32 to vector<2x32xf32>
      %c0_53 = arith.constant 0 : index
      %c0_54 = arith.constant 0 : index
      %179 = vector.load %arg5[%c0_53, %c0_54] : memref<2x32xf32, #tpu.memory_space<vmem>>, vector<2x32xf32>
      tpu.vector_store %arg5[%c0_53, %c0_54], %178 {strides = array<i32>} : memref<2x32xf32, #tpu.memory_space<vmem>>, vector<2x32xf32>,
      %cst_55 = arith.constant 0.000000e+00 : f32
      %180 = vector.broadcast %cst_55 : f32 to vector<2x32xf32>
      %c0_56 = arith.constant 0 : index
      %c0_57 = arith.constant 0 : index
      %181 = vector.load %arg6[%c0_56, %c0_57] : memref<2x32xf32, #tpu.memory_space<vmem>>, vector<2x32xf32>
      tpu.vector_store %arg6[%c0_56, %c0_57], %180 {strides = array<i32>} : memref<2x32xf32, #tpu.memory_space<vmem>>, vector<2x32xf32>,
    } else {
    }
    %c0 = arith.constant 0 : index
    %c0_1 = arith.constant 0 : index
    %3 = vector.load %arg3[%c0, %c0_1] : memref<32x128xf32, #tpu.memory_space<vmem>>, vector<32x128xf32>
    %c0_2 = arith.constant 0 : index
    %c0_3 = arith.constant 0 : index
    %4 = vector.load %arg5[%c0_2, %c0_3] : memref<2x32xf32, #tpu.memory_space<vmem>>, vector<2x32xf32>
    %c0_4 = arith.constant 0 : index
    %c0_5 = arith.constant 0 : index
    %5 = vector.load %arg6[%c0_4, %c0_5] : memref<2x32xf32, #tpu.memory_space<vmem>>, vector<2x32xf32>
    %c0_6 = arith.constant 0 : index
    %c0_7 = arith.constant 0 : index
    %6 = vector.load %arg2[%c0_6, %c0_7] : memref<2x1024xf32, #tpu.memory_space<vmem>>, vector<2x128xf32>
    %cst = arith.constant dense<0.000000e+00> : vector<2x128xf32>
    %7 = tpu.matmul %4, %3, %cst {dimension_numbers = #tpu.dot_dimension_numbers<[1], [0], [0], [1], [0, 0, 1, 1], [], []>} : vector<2x32xf32>, vector<32x128xf32>, vector<2x128xf32> -> vector<2x128xf32>
    %8 = arith.addf %6, %7 : vector<2x128xf32>
    %9 = arith.negf %8 : vector<2x128xf32>
    %10 = math.exp %9 : vector<2x128xf32>
    %cst_8 = arith.constant 1.000000e+00 : f32
    %11 = vector.broadcast %cst_8 : f32 to vector<2x128xf32>
    %12 = arith.addf %11, %10 : vector<2x128xf32>
    %13 = arith.divf %11, %12 : vector<2x128xf32>
    %14 = vector.extract_strided_slice %13 {offsets = [0, 0], sizes = [2, 32], strides = [1, 1]} : vector<2x128xf32> to vector<2x32xf32>
    %15 = vector.extract_strided_slice %13 {offsets = [0, 32], sizes = [2, 32], strides = [1, 1]} : vector<2x128xf32> to vector<2x32xf32>
    %16 = vector.extract_strided_slice %13 {offsets = [0, 64], sizes = [2, 32], strides = [1, 1]} : vector<2x128xf32> to vector<2x32xf32>
    %cst_9 = arith.constant 2.000000e+00 : f32
    %17 = vector.broadcast %cst_9 : f32 to vector<2x32xf32>
    %18 = arith.mulf %17, %16 : vector<2x32xf32>
    %cst_10 = arith.constant 1.000000e+00 : f32
    %19 = vector.broadcast %cst_10 : f32 to vector<2x32xf32>
    %20 = arith.subf %18, %19 : vector<2x32xf32>
    %21 = vector.extract_strided_slice %13 {offsets = [0, 96], sizes = [2, 32], strides = [1, 1]} : vector<2x128xf32> to vector<2x32xf32>
    %22 = arith.mulf %15, %5 : vector<2x32xf32>
    %23 = arith.mulf %14, %20 : vector<2x32xf32>
    %24 = arith.addf %22, %23 : vector<2x32xf32>
    %25 = math.tanh %24 : vector<2x32xf32>
    %26 = arith.mulf %21, %25 : vector<2x32xf32>
    %c0_11 = arith.constant 0 : index
    %c128 = arith.constant 128 : index
    %27 = vector.load %arg2[%c0_11, %c128] : memref<2x1024xf32, #tpu.memory_space<vmem>>, vector<2x128xf32>
    %cst_12 = arith.constant dense<0.000000e+00> : vector<2x128xf32>
    %28 = tpu.matmul %26, %3, %cst_12 {dimension_numbers = #tpu.dot_dimension_numbers<[1], [0], [0], [1], [0, 0, 1, 1], [], []>} : vector<2x32xf32>, vector<32x128xf32>, vector<2x128xf32> -> vector<2x128xf32>
    %29 = arith.addf %27, %28 : vector<2x128xf32>
    %30 = arith.negf %29 : vector<2x128xf32>
    %31 = math.exp %30 : vector<2x128xf32>
    %cst_13 = arith.constant 1.000000e+00 : f32
    %32 = vector.broadcast %cst_13 : f32 to vector<2x128xf32>
    %33 = arith.addf %32, %31 : vector<2x128xf32>
    %34 = arith.divf %32, %33 : vector<2x128xf32>
    %35 = vector.extract_strided_slice %34 {offsets = [0, 0], sizes = [2, 32], strides = [1, 1]} : vector<2x128xf32> to vector<2x32xf32>
    %36 = vector.extract_strided_slice %34 {offsets = [0, 32], sizes = [2, 32], strides = [1, 1]} : vector<2x128xf32> to vector<2x32xf32>
    %37 = vector.extract_strided_slice %34 {offsets = [0, 64], sizes = [2, 32], strides = [1, 1]} : vector<2x128xf32> to vector<2x32xf32>
    %cst_14 = arith.constant 2.000000e+00 : f32
    %38 = vector.broadcast %cst_14 : f32 to vector<2x32xf32>
    %39 = arith.mulf %38, %37 : vector<2x32xf32>
    %cst_15 = arith.constant 1.000000e+00 : f32
    %40 = vector.broadcast %cst_15 : f32 to vector<2x32xf32>
    %41 = arith.subf %39, %40 : vector<2x32xf32>
    %42 = vector.extract_strided_slice %34 {offsets = [0, 96], sizes = [2, 32], strides = [1, 1]} : vector<2x128xf32> to vector<2x32xf32>
    %43 = arith.mulf %36, %24 : vector<2x32xf32>
    %44 = arith.mulf %35, %41 : vector<2x32xf32>
    %45 = arith.addf %43, %44 : vector<2x32xf32>
    %46 = math.tanh %45 : vector<2x32xf32>
    %47 = arith.mulf %42, %46 : vector<2x32xf32>
    %c0_16 = arith.constant 0 : index
    %c256 = arith.constant 256 : index
    %48 = vector.load %arg2[%c0_16, %c256] : memref<2x1024xf32, #tpu.memory_space<vmem>>, vector<2x128xf32>
    %cst_17 = arith.constant dense<0.000000e+00> : vector<2x128xf32>
    %49 = tpu.matmul %47, %3, %cst_17 {dimension_numbers = #tpu.dot_dimension_numbers<[1], [0], [0], [1], [0, 0, 1, 1], [], []>} : vector<2x32xf32>, vector<32x128xf32>, vector<2x128xf32> -> vector<2x128xf32>
    %50 = arith.addf %48, %49 : vector<2x128xf32>
    %51 = arith.negf %50 : vector<2x128xf32>
    %52 = math.exp %51 : vector<2x128xf32>
    %cst_18 = arith.constant 1.000000e+00 : f32
    %53 = vector.broadcast %cst_18 : f32 to vector<2x128xf32>
    %54 = arith.addf %53, %52 : vector<2x128xf32>
    %55 = arith.divf %53, %54 : vector<2x128xf32>
    %56 = vector.extract_strided_slice %55 {offsets = [0, 0], sizes = [2, 32], strides = [1, 1]} : vector<2x128xf32> to vector<2x32xf32>
    %57 = vector.extract_strided_slice %55 {offsets = [0, 32], sizes = [2, 32], strides = [1, 1]} : vector<2x128xf32> to vector<2x32xf32>
    %58 = vector.extract_strided_slice %55 {offsets = [0, 64], sizes = [2, 32], strides = [1, 1]} : vector<2x128xf32> to vector<2x32xf32>
    %cst_19 = arith.constant 2.000000e+00 : f32
    %59 = vector.broadcast %cst_19 : f32 to vector<2x32xf32>
    %60 = arith.mulf %59, %58 : vector<2x32xf32>
    %cst_20 = arith.constant 1.000000e+00 : f32
    %61 = vector.broadcast %cst_20 : f32 to vector<2x32xf32>
    %62 = arith.subf %60, %61 : vector<2x32xf32>
    %63 = vector.extract_strided_slice %55 {offsets = [0, 96], sizes = [2, 32], strides = [1, 1]} : vector<2x128xf32> to vector<2x32xf32>
    %64 = arith.mulf %57, %45 : vector<2x32xf32>
    %65 = arith.mulf %56, %62 : vector<2x32xf32>
    %66 = arith.addf %64, %65 : vector<2x32xf32>
    %67 = math.tanh %66 : vector<2x32xf32>
    %68 = arith.mulf %63, %67 : vector<2x32xf32>
    %c0_21 = arith.constant 0 : index
    %c384 = arith.constant 384 : index
    %69 = vector.load %arg2[%c0_21, %c384] : memref<2x1024xf32, #tpu.memory_space<vmem>>, vector<2x128xf32>
    %cst_22 = arith.constant dense<0.000000e+00> : vector<2x128xf32>
    %70 = tpu.matmul %68, %3, %cst_22 {dimension_numbers = #tpu.dot_dimension_numbers<[1], [0], [0], [1], [0, 0, 1, 1], [], []>} : vector<2x32xf32>, vector<32x128xf32>, vector<2x128xf32> -> vector<2x128xf32>
    %71 = arith.addf %69, %70 : vector<2x128xf32>
    %72 = arith.negf %71 : vector<2x128xf32>
    %73 = math.exp %72 : vector<2x128xf32>
    %cst_23 = arith.constant 1.000000e+00 : f32
    %74 = vector.broadcast %cst_23 : f32 to vector<2x128xf32>
    %75 = arith.addf %74, %73 : vector<2x128xf32>
    %76 = arith.divf %74, %75 : vector<2x128xf32>
    %77 = vector.extract_strided_slice %76 {offsets = [0, 0], sizes = [2, 32], strides = [1, 1]} : vector<2x128xf32> to vector<2x32xf32>
    %78 = vector.extract_strided_slice %76 {offsets = [0, 32], sizes = [2, 32], strides = [1, 1]} : vector<2x128xf32> to vector<2x32xf32>
    %79 = vector.extract_strided_slice %76 {offsets = [0, 64], sizes = [2, 32], strides = [1, 1]} : vector<2x128xf32> to vector<2x32xf32>
    %cst_24 = arith.constant 2.000000e+00 : f32
    %80 = vector.broadcast %cst_24 : f32 to vector<2x32xf32>
    %81 = arith.mulf %80, %79 : vector<2x32xf32>
    %cst_25 = arith.constant 1.000000e+00 : f32
    %82 = vector.broadcast %cst_25 : f32 to vector<2x32xf32>
    %83 = arith.subf %81, %82 : vector<2x32xf32>
    %84 = vector.extract_strided_slice %76 {offsets = [0, 96], sizes = [2, 32], strides = [1, 1]} : vector<2x128xf32> to vector<2x32xf32>
    %85 = arith.mulf %78, %66 : vector<2x32xf32>
    %86 = arith.mulf %77, %83 : vector<2x32xf32>
    %87 = arith.addf %85, %86 : vector<2x32xf32>
    %88 = math.tanh %87 : vector<2x32xf32>
    %89 = arith.mulf %84, %88 : vector<2x32xf32>
    %c0_26 = arith.constant 0 : index
    %c512 = arith.constant 512 : index
    %90 = vector.load %arg2[%c0_26, %c512] : memref<2x1024xf32, #tpu.memory_space<vmem>>, vector<2x128xf32>
    %cst_27 = arith.constant dense<0.000000e+00> : vector<2x128xf32>
    %91 = tpu.matmul %89, %3, %cst_27 {dimension_numbers = #tpu.dot_dimension_numbers<[1], [0], [0], [1], [0, 0, 1, 1], [], []>} : vector<2x32xf32>, vector<32x128xf32>, vector<2x128xf32> -> vector<2x128xf32>
    %92 = arith.addf %90, %91 : vector<2x128xf32>
    %93 = arith.negf %92 : vector<2x128xf32>
    %94 = math.exp %93 : vector<2x128xf32>
    %cst_28 = arith.constant 1.000000e+00 : f32
    %95 = vector.broadcast %cst_28 : f32 to vector<2x128xf32>
    %96 = arith.addf %95, %94 : vector<2x128xf32>
    %97 = arith.divf %95, %96 : vector<2x128xf32>
    %98 = vector.extract_strided_slice %97 {offsets = [0, 0], sizes = [2, 32], strides = [1, 1]} : vector<2x128xf32> to vector<2x32xf32>
    %99 = vector.extract_strided_slice %97 {offsets = [0, 32], sizes = [2, 32], strides = [1, 1]} : vector<2x128xf32> to vector<2x32xf32>
    %100 = vector.extract_strided_slice %97 {offsets = [0, 64], sizes = [2, 32], strides = [1, 1]} : vector<2x128xf32> to vector<2x32xf32>
    %cst_29 = arith.constant 2.000000e+00 : f32
    %101 = vector.broadcast %cst_29 : f32 to vector<2x32xf32>
    %102 = arith.mulf %101, %100 : vector<2x32xf32>
    %cst_30 = arith.constant 1.000000e+00 : f32
    %103 = vector.broadcast %cst_30 : f32 to vector<2x32xf32>
    %104 = arith.subf %102, %103 : vector<2x32xf32>
    %105 = vector.extract_strided_slice %97 {offsets = [0, 96], sizes = [2, 32], strides = [1, 1]} : vector<2x128xf32> to vector<2x32xf32>
    %106 = arith.mulf %99, %87 : vector<2x32xf32>
    %107 = arith.mulf %98, %104 : vector<2x32xf32>
    %108 = arith.addf %106, %107 : vector<2x32xf32>
    %109 = math.tanh %108 : vector<2x32xf32>
    %110 = arith.mulf %105, %109 : vector<2x32xf32>
    %c0_31 = arith.constant 0 : index
    %c640 = arith.constant 640 : index
    %111 = vector.load %arg2[%c0_31, %c640] : memref<2x1024xf32, #tpu.memory_space<vmem>>, vector<2x128xf32>
    %cst_32 = arith.constant dense<0.000000e+00> : vector<2x128xf32>
    %112 = tpu.matmul %110, %3, %cst_32 {dimension_numbers = #tpu.dot_dimension_numbers<[1], [0], [0], [1], [0, 0, 1, 1], [], []>} : vector<2x32xf32>, vector<32x128xf32>, vector<2x128xf32> -> vector<2x128xf32>
    %113 = arith.addf %111, %112 : vector<2x128xf32>
    %114 = arith.negf %113 : vector<2x128xf32>
    %115 = math.exp %114 : vector<2x128xf32>
    %cst_33 = arith.constant 1.000000e+00 : f32
    %116 = vector.broadcast %cst_33 : f32 to vector<2x128xf32>
    %117 = arith.addf %116, %115 : vector<2x128xf32>
    %118 = arith.divf %116, %117 : vector<2x128xf32>
    %119 = vector.extract_strided_slice %118 {offsets = [0, 0], sizes = [2, 32], strides = [1, 1]} : vector<2x128xf32> to vector<2x32xf32>
    %120 = vector.extract_strided_slice %118 {offsets = [0, 32], sizes = [2, 32], strides = [1, 1]} : vector<2x128xf32> to vector<2x32xf32>
    %121 = vector.extract_strided_slice %118 {offsets = [0, 64], sizes = [2, 32], strides = [1, 1]} : vector<2x128xf32> to vector<2x32xf32>
    %cst_34 = arith.constant 2.000000e+00 : f32
    %122 = vector.broadcast %cst_34 : f32 to vector<2x32xf32>
    %123 = arith.mulf %122, %121 : vector<2x32xf32>
    %cst_35 = arith.constant 1.000000e+00 : f32
    %124 = vector.broadcast %cst_35 : f32 to vector<2x32xf32>
    %125 = arith.subf %123, %124 : vector<2x32xf32>
    %126 = vector.extract_strided_slice %118 {offsets = [0, 96], sizes = [2, 32], strides = [1, 1]} : vector<2x128xf32> to vector<2x32xf32>
    %127 = arith.mulf %120, %108 : vector<2x32xf32>
    %128 = arith.mulf %119, %125 : vector<2x32xf32>
    %129 = arith.addf %127, %128 : vector<2x32xf32>
    %130 = math.tanh %129 : vector<2x32xf32>
    %131 = arith.mulf %126, %130 : vector<2x32xf32>
    %c0_36 = arith.constant 0 : index
    %c768 = arith.constant 768 : index
    %132 = vector.load %arg2[%c0_36, %c768] : memref<2x1024xf32, #tpu.memory_space<vmem>>, vector<2x128xf32>
    %cst_37 = arith.constant dense<0.000000e+00> : vector<2x128xf32>
    %133 = tpu.matmul %131, %3, %cst_37 {dimension_numbers = #tpu.dot_dimension_numbers<[1], [0], [0], [1], [0, 0, 1, 1], [], []>} : vector<2x32xf32>, vector<32x128xf32>, vector<2x128xf32> -> vector<2x128xf32>
    %134 = arith.addf %132, %133 : vector<2x128xf32>
    %135 = arith.negf %134 : vector<2x128xf32>
    %136 = math.exp %135 : vector<2x128xf32>
    %cst_38 = arith.constant 1.000000e+00 : f32
    %137 = vector.broadcast %cst_38 : f32 to vector<2x128xf32>
    %138 = arith.addf %137, %136 : vector<2x128xf32>
    %139 = arith.divf %137, %138 : vector<2x128xf32>
    %140 = vector.extract_strided_slice %139 {offsets = [0, 0], sizes = [2, 32], strides = [1, 1]} : vector<2x128xf32> to vector<2x32xf32>
    %141 = vector.extract_strided_slice %139 {offsets = [0, 32], sizes = [2, 32], strides = [1, 1]} : vector<2x128xf32> to vector<2x32xf32>
    %142 = vector.extract_strided_slice %139 {offsets = [0, 64], sizes = [2, 32], strides = [1, 1]} : vector<2x128xf32> to vector<2x32xf32>
    %cst_39 = arith.constant 2.000000e+00 : f32
    %143 = vector.broadcast %cst_39 : f32 to vector<2x32xf32>
    %144 = arith.mulf %143, %142 : vector<2x32xf32>
    %cst_40 = arith.constant 1.000000e+00 : f32
    %145 = vector.broadcast %cst_40 : f32 to vector<2x32xf32>
    %146 = arith.subf %144, %145 : vector<2x32xf32>
    %147 = vector.extract_strided_slice %139 {offsets = [0, 96], sizes = [2, 32], strides = [1, 1]} : vector<2x128xf32> to vector<2x32xf32>
    %148 = arith.mulf %141, %129 : vector<2x32xf32>
    %149 = arith.mulf %140, %146 : vector<2x32xf32>
    %150 = arith.addf %148, %149 : vector<2x32xf32>
    %151 = math.tanh %150 : vector<2x32xf32>
    %152 = arith.mulf %147, %151 : vector<2x32xf32>
    %c0_41 = arith.constant 0 : index
    %c896 = arith.constant 896 : index
    %153 = vector.load %arg2[%c0_41, %c896] : memref<2x1024xf32, #tpu.memory_space<vmem>>, vector<2x128xf32>
    %cst_42 = arith.constant dense<0.000000e+00> : vector<2x128xf32>
    %154 = tpu.matmul %152, %3, %cst_42 {dimension_numbers = #tpu.dot_dimension_numbers<[1], [0], [0], [1], [0, 0, 1, 1], [], []>} : vector<2x32xf32>, vector<32x128xf32>, vector<2x128xf32> -> vector<2x128xf32>
    %155 = arith.addf %153, %154 : vector<2x128xf32>
    %156 = arith.negf %155 : vector<2x128xf32>
    %157 = math.exp %156 : vector<2x128xf32>
    %cst_43 = arith.constant 1.000000e+00 : f32
    %158 = vector.broadcast %cst_43 : f32 to vector<2x128xf32>
    %159 = arith.addf %158, %157 : vector<2x128xf32>
    %160 = arith.divf %158, %159 : vector<2x128xf32>
    %161 = vector.extract_strided_slice %160 {offsets = [0, 0], sizes = [2, 32], strides = [1, 1]} : vector<2x128xf32> to vector<2x32xf32>
    %162 = vector.extract_strided_slice %160 {offsets = [0, 32], sizes = [2, 32], strides = [1, 1]} : vector<2x128xf32> to vector<2x32xf32>
    %163 = vector.extract_strided_slice %160 {offsets = [0, 64], sizes = [2, 32], strides = [1, 1]} : vector<2x128xf32> to vector<2x32xf32>
    %cst_44 = arith.constant 2.000000e+00 : f32
    %164 = vector.broadcast %cst_44 : f32 to vector<2x32xf32>
    %165 = arith.mulf %164, %163 : vector<2x32xf32>
    %cst_45 = arith.constant 1.000000e+00 : f32
    %166 = vector.broadcast %cst_45 : f32 to vector<2x32xf32>
    %167 = arith.subf %165, %166 : vector<2x32xf32>
    %168 = vector.extract_strided_slice %160 {offsets = [0, 96], sizes = [2, 32], strides = [1, 1]} : vector<2x128xf32> to vector<2x32xf32>
    %169 = arith.mulf %162, %150 : vector<2x32xf32>
    %170 = arith.mulf %161, %167 : vector<2x32xf32>
    %171 = arith.addf %169, %170 : vector<2x32xf32>
    %172 = math.tanh %171 : vector<2x32xf32>
    %173 = arith.mulf %168, %172 : vector<2x32xf32>
    %174 = tpu.concatenate %26, %47, %68, %89, %110, %131, %152, %173 in 1 : vector<2x32xf32>, vector<2x32xf32>, vector<2x32xf32>, vector<2x32xf32>, vector<2x32xf32>, vector<2x32xf32>, vector<2x32xf32>, vector<2x32xf32> -> vector<2x256xf32>
    %c0_46 = arith.constant 0 : index
    %c0_47 = arith.constant 0 : index
    %175 = vector.load %arg4[%c0_46, %c0_47] : memref<2x256xf32, #tpu.memory_space<vmem>>, vector<2x256xf32>
    tpu.vector_store %arg4[%c0_46, %c0_47], %174 {strides = array<i32>} : memref<2x256xf32, #tpu.memory_space<vmem>>, vector<2x256xf32>,
    %c0_48 = arith.constant 0 : index
    %c0_49 = arith.constant 0 : index
    %176 = vector.load %arg5[%c0_48, %c0_49] : memref<2x32xf32, #tpu.memory_space<vmem>>, vector<2x32xf32>
    tpu.vector_store %arg5[%c0_48, %c0_49], %173 {strides = array<i32>} : memref<2x32xf32, #tpu.memory_space<vmem>>, vector<2x32xf32>,
    %c0_50 = arith.constant 0 : index
    %c0_51 = arith.constant 0 : index
    %177 = vector.load %arg6[%c0_50, %c0_51] : memref<2x32xf32, #tpu.memory_space<vmem>>, vector<2x32xf32>
    tpu.vector_store %arg6[%c0_50, %c0_51], %171 {strides = array<i32>} : memref<2x32xf32, #tpu.memory_space<vmem>>, vector<2x32xf32>,
    return
  }
  func.func @transform_0(%arg0: i32, %arg1: i32) -> (i32, i32) {
    %c0_i32 = arith.constant 0 : i32
    return %arg0, %arg1 : i32, i32
  }
  func.func @transform_1(%arg0: i32, %arg1: i32) -> (i32, i32) {
    %c0_i32 = arith.constant 0 : i32
    %c0_i32_0 = arith.constant 0 : i32
    %c0_i32_1 = arith.constant 0 : i32
    return %c0_i32, %c0_i32_0 : i32, i32
  }
  func.func @transform_2(%arg0: i32, %arg1: i32) -> (i32, i32) {
    %c0_i32 = arith.constant 0 : i32
    return %arg0, %arg1 : i32, i32
  }
}

module attributes {stable_mosaic.version = 11 : i64} {
  func.func @ffn_kernel(%arg0: i32, %arg1: i32, %arg2: memref<16x32xf32, #tpu.memory_space<vmem>>, %arg3: memref<16x32xf32, #tpu.memory_space<vmem>>, %arg4: memref<1x32xf32, #tpu.memory_space<vmem>>, %arg5: memref<1x32xf32, #tpu.memory_space<vmem>>, %arg6: memref<32x128xf32, #tpu.memory_space<vmem>>, %arg7: memref<1x128xf32, #tpu.memory_space<vmem>>, %arg8: memref<128x32xf32, #tpu.memory_space<vmem>>, %arg9: memref<1x32xf32, #tpu.memory_space<vmem>>, %arg10: memref<16x32xf32, #tpu.memory_space<vmem>>, %arg11: memref<16x32xf32, #tpu.memory_space<vmem>>, %arg12: memref<16x32xf32, #tpu.memory_space<vmem>>, %arg13: memref<16x32xf32, #tpu.memory_space<vmem>>) attributes {dimension_semantics = [#tpu.dimension_semantics<parallel>, #tpu.dimension_semantics<arbitrary>], iteration_bounds = array<i64: 1, 1>, scalar_prefetch = 0 : i64, scratch_operands = 3 : i64, tpu.core_type = #tpu.core_type<tc>, window_params = [{transform_indices = @transform_0, window_bounds = array<i64: 16, 32>}, {transform_indices = @transform_1, window_bounds = array<i64: 16, 32>}, {pipeline_mode = #tpu.pipeline_mode<synchronous>, transform_indices = @transform_2, window_bounds = array<i64: 1, 32>}, {pipeline_mode = #tpu.pipeline_mode<synchronous>, transform_indices = @transform_3, window_bounds = array<i64: 1, 32>}, {transform_indices = @transform_4, window_bounds = array<i64: 32, 128>}, {transform_indices = @transform_5, window_bounds = array<i64: 1, 128>}, {transform_indices = @transform_6, window_bounds = array<i64: 128, 32>}, {pipeline_mode = #tpu.pipeline_mode<synchronous>, transform_indices = @transform_7, window_bounds = array<i64: 1, 32>}, {transform_indices = @transform_8, window_bounds = array<i64: 16, 32>}]} {
    %c0_i32 = arith.constant 0 : i32
    %0 = arith.cmpi eq, %arg1, %c0_i32 : i32
    %1 = arith.extui %0 : i1 to i32
    %c0_i32_0 = arith.constant 0 : i32
    %2 = arith.cmpi ne, %1, %c0_i32_0 : i32
    scf.if %2 {
      %c0_16 = arith.constant 0 : index
      %c0_17 = arith.constant 0 : index
      %19 = vector.load %arg2[%c0_16, %c0_17] : memref<16x32xf32, #tpu.memory_space<vmem>>, vector<16x32xf32>
      %c0_18 = arith.constant 0 : index
      %c0_19 = arith.constant 0 : index
      %20 = vector.load %arg3[%c0_18, %c0_19] : memref<16x32xf32, #tpu.memory_space<vmem>>, vector<16x32xf32>
      %21 = arith.addf %19, %20 : vector<16x32xf32>
      %c0_20 = arith.constant 0 : index
      %c0_21 = arith.constant 0 : index
      %22 = vector.load %arg11[%c0_20, %c0_21] : memref<16x32xf32, #tpu.memory_space<vmem>>, vector<16x32xf32>
      tpu.vector_store %arg11[%c0_20, %c0_21], %21 {strides = array<i32>} : memref<16x32xf32, #tpu.memory_space<vmem>>, vector<16x32xf32>,
      %c0_22 = arith.constant 0 : index
      %c0_23 = arith.constant 0 : index
      %23 = vector.load %arg4[%c0_22, %c0_23] : memref<1x32xf32, #tpu.memory_space<vmem>>, vector<1x32xf32>
      %c0_24 = arith.constant 0 : index
      %c0_25 = arith.constant 0 : index
      %24 = vector.load %arg5[%c0_24, %c0_25] : memref<1x32xf32, #tpu.memory_space<vmem>>, vector<1x32xf32>
      %cst_26 = arith.constant dense<0.000000e+00> : vector<16xf32>
      %25 = vector.multi_reduction <add>, %21, %cst_26 [1] : vector<16x32xf32> to vector<16xf32>
      %26 = vector.shape_cast %25 : vector<16xf32> to vector<16x1xf32>
      %cst_27 = arith.constant 3.200000e+01 : f32
      %27 = vector.broadcast %cst_27 : f32 to vector<16x1xf32>
      %28 = arith.divf %26, %27 : vector<16x1xf32>
      %29 = vector.broadcast %28 : vector<16x1xf32> to vector<16x32xf32>
      %30 = arith.subf %21, %29 : vector<16x32xf32>
      %31 = arith.mulf %30, %30 : vector<16x32xf32>
      %cst_28 = arith.constant dense<0.000000e+00> : vector<16xf32>
      %32 = vector.multi_reduction <add>, %31, %cst_28 [1] : vector<16x32xf32> to vector<16xf32>
      %33 = vector.shape_cast %32 : vector<16xf32> to vector<16x1xf32>
      %cst_29 = arith.constant 3.200000e+01 : f32
      %34 = vector.broadcast %cst_29 : f32 to vector<16x1xf32>
      %35 = arith.divf %33, %34 : vector<16x1xf32>
      %36 = vector.broadcast %28 : vector<16x1xf32> to vector<16x32xf32>
      %37 = arith.subf %21, %36 : vector<16x32xf32>
      %cst_30 = arith.constant 9.99999974E-6 : f32
      %38 = vector.broadcast %cst_30 : f32 to vector<16x1xf32>
      %39 = arith.addf %35, %38 : vector<16x1xf32>
      %40 = math.rsqrt %39 : vector<16x1xf32>
      %41 = vector.broadcast %40 : vector<16x1xf32> to vector<16x32xf32>
      %42 = arith.mulf %37, %41 : vector<16x32xf32>
      %43 = vector.broadcast %23 : vector<1x32xf32> to vector<16x32xf32>
      %44 = arith.mulf %42, %43 : vector<16x32xf32>
      %45 = vector.broadcast %24 : vector<1x32xf32> to vector<16x32xf32>
      %46 = arith.addf %44, %45 : vector<16x32xf32>
      %c0_31 = arith.constant 0 : index
      %c0_32 = arith.constant 0 : index
      %47 = vector.load %arg12[%c0_31, %c0_32] : memref<16x32xf32, #tpu.memory_space<vmem>>, vector<16x32xf32>
      tpu.vector_store %arg12[%c0_31, %c0_32], %46 {strides = array<i32>} : memref<16x32xf32, #tpu.memory_space<vmem>>, vector<16x32xf32>,
      %cst_33 = arith.constant 0.000000e+00 : f32
      %48 = vector.broadcast %cst_33 : f32 to vector<16x32xf32>
      %c0_34 = arith.constant 0 : index
      %c0_35 = arith.constant 0 : index
      %49 = vector.load %arg13[%c0_34, %c0_35] : memref<16x32xf32, #tpu.memory_space<vmem>>, vector<16x32xf32>
      tpu.vector_store %arg13[%c0_34, %c0_35], %48 {strides = array<i32>} : memref<16x32xf32, #tpu.memory_space<vmem>>, vector<16x32xf32>,
    } else {
    }
    %c0 = arith.constant 0 : index
    %c0_1 = arith.constant 0 : index
    %3 = vector.load %arg12[%c0, %c0_1] : memref<16x32xf32, #tpu.memory_space<vmem>>, vector<16x32xf32>
    %c0_2 = arith.constant 0 : index
    %c0_3 = arith.constant 0 : index
    %4 = vector.load %arg6[%c0_2, %c0_3] : memref<32x128xf32, #tpu.memory_space<vmem>>, vector<32x128xf32>
    %cst = arith.constant dense<0.000000e+00> : vector<16x128xf32>
    %5 = tpu.matmul %3, %4, %cst {dimension_numbers = #tpu.dot_dimension_numbers<[1], [0], [0], [1], [0, 0, 1, 1], [], []>} : vector<16x32xf32>, vector<32x128xf32>, vector<16x128xf32> -> vector<16x128xf32>
    %c0_4 = arith.constant 0 : index
    %c0_5 = arith.constant 0 : index
    %6 = vector.load %arg7[%c0_4, %c0_5] : memref<1x128xf32, #tpu.memory_space<vmem>>, vector<1x128xf32>
    %7 = vector.broadcast %6 : vector<1x128xf32> to vector<16x128xf32>
    %8 = arith.addf %5, %7 : vector<16x128xf32>
    %cst_6 = arith.constant 0.000000e+00 : f32
    %9 = vector.broadcast %cst_6 : f32 to vector<16x128xf32>
    %10 = arith.maximumf %8, %9 : vector<16x128xf32>
    %c0_7 = arith.constant 0 : index
    %c0_8 = arith.constant 0 : index
    %11 = vector.load %arg13[%c0_7, %c0_8] : memref<16x32xf32, #tpu.memory_space<vmem>>, vector<16x32xf32>
    %c0_9 = arith.constant 0 : index
    %c0_10 = arith.constant 0 : index
    %12 = vector.load %arg8[%c0_9, %c0_10] : memref<128x32xf32, #tpu.memory_space<vmem>>, vector<128x32xf32>
    %cst_11 = arith.constant dense<0.000000e+00> : vector<16x32xf32>
    %13 = tpu.matmul %10, %12, %cst_11 {dimension_numbers = #tpu.dot_dimension_numbers<[1], [0], [0], [1], [0, 0, 1, 1], [], []>} : vector<16x128xf32>, vector<128x32xf32>, vector<16x32xf32> -> vector<16x32xf32>
    %14 = arith.addf %11, %13 : vector<16x32xf32>
    %c0_12 = arith.constant 0 : index
    %c0_13 = arith.constant 0 : index
    %15 = vector.load %arg13[%c0_12, %c0_13] : memref<16x32xf32, #tpu.memory_space<vmem>>, vector<16x32xf32>
    tpu.vector_store %arg13[%c0_12, %c0_13], %14 {strides = array<i32>} : memref<16x32xf32, #tpu.memory_space<vmem>>, vector<16x32xf32>,
    %c0_i32_14 = arith.constant 0 : i32
    %16 = arith.cmpi eq, %arg1, %c0_i32_14 : i32
    %17 = arith.extui %16 : i1 to i32
    %c0_i32_15 = arith.constant 0 : i32
    %18 = arith.cmpi ne, %17, %c0_i32_15 : i32
    scf.if %18 {
      %c0_16 = arith.constant 0 : index
      %c0_17 = arith.constant 0 : index
      %19 = vector.load %arg11[%c0_16, %c0_17] : memref<16x32xf32, #tpu.memory_space<vmem>>, vector<16x32xf32>
      %c0_18 = arith.constant 0 : index
      %c0_19 = arith.constant 0 : index
      %20 = vector.load %arg13[%c0_18, %c0_19] : memref<16x32xf32, #tpu.memory_space<vmem>>, vector<16x32xf32>
      %21 = arith.addf %19, %20 : vector<16x32xf32>
      %c0_20 = arith.constant 0 : index
      %c0_21 = arith.constant 0 : index
      %22 = vector.load %arg9[%c0_20, %c0_21] : memref<1x32xf32, #tpu.memory_space<vmem>>, vector<1x32xf32>
      %23 = vector.broadcast %22 : vector<1x32xf32> to vector<16x32xf32>
      %24 = arith.addf %21, %23 : vector<16x32xf32>
      %c0_22 = arith.constant 0 : index
      %c0_23 = arith.constant 0 : index
      %25 = vector.load %arg10[%c0_22, %c0_23] : memref<16x32xf32, #tpu.memory_space<vmem>>, vector<16x32xf32>
      tpu.vector_store %arg10[%c0_22, %c0_23], %24 {strides = array<i32>} : memref<16x32xf32, #tpu.memory_space<vmem>>, vector<16x32xf32>,
    } else {
    }
    return
  }
  func.func @transform_0(%arg0: i32, %arg1: i32) -> (i32, i32) {
    %c0_i32 = arith.constant 0 : i32
    %c0_i32_0 = arith.constant 0 : i32
    return %arg0, %c0_i32 : i32, i32
  }
  func.func @transform_1(%arg0: i32, %arg1: i32) -> (i32, i32) {
    %c0_i32 = arith.constant 0 : i32
    %c0_i32_0 = arith.constant 0 : i32
    return %arg0, %c0_i32 : i32, i32
  }
  func.func @transform_2(%arg0: i32, %arg1: i32) -> (i32, i32) {
    %c0_i32 = arith.constant 0 : i32
    %c0_i32_0 = arith.constant 0 : i32
    %c0_i32_1 = arith.constant 0 : i32
    return %c0_i32, %c0_i32_0 : i32, i32
  }
  func.func @transform_3(%arg0: i32, %arg1: i32) -> (i32, i32) {
    %c0_i32 = arith.constant 0 : i32
    %c0_i32_0 = arith.constant 0 : i32
    %c0_i32_1 = arith.constant 0 : i32
    return %c0_i32, %c0_i32_0 : i32, i32
  }
  func.func @transform_4(%arg0: i32, %arg1: i32) -> (i32, i32) {
    %c0_i32 = arith.constant 0 : i32
    %c0_i32_0 = arith.constant 0 : i32
    return %c0_i32, %arg1 : i32, i32
  }
  func.func @transform_5(%arg0: i32, %arg1: i32) -> (i32, i32) {
    %c0_i32 = arith.constant 0 : i32
    %c0_i32_0 = arith.constant 0 : i32
    return %c0_i32, %arg1 : i32, i32
  }
  func.func @transform_6(%arg0: i32, %arg1: i32) -> (i32, i32) {
    %c0_i32 = arith.constant 0 : i32
    %c0_i32_0 = arith.constant 0 : i32
    return %arg1, %c0_i32 : i32, i32
  }
  func.func @transform_7(%arg0: i32, %arg1: i32) -> (i32, i32) {
    %c0_i32 = arith.constant 0 : i32
    %c0_i32_0 = arith.constant 0 : i32
    %c0_i32_1 = arith.constant 0 : i32
    return %c0_i32, %c0_i32_0 : i32, i32
  }
  func.func @transform_8(%arg0: i32, %arg1: i32) -> (i32, i32) {
    %c0_i32 = arith.constant 0 : i32
    %c0_i32_0 = arith.constant 0 : i32
    return %arg0, %c0_i32 : i32, i32
  }
}

</mosaic_0001>

<bundles_post_ra>
// kernel: lstm_block_forward.3
= control target key start
LH: loop header
LB: loop body
LE: loop exit
PB: predicated region body
PF: predicated region fallthrough
CT: control target
= control target key end

     0   :  { %vm24_vm0 = vcmask 261120   ;;  %s269_s0 = inlined_call_operand.vmem [shape: f32[16,32], index: 0, kind: input, shape index: {}]   ;;  %s270_s3 = inlined_call_operand.vmem [shape: f32[32,128], index: 3, kind: input, shape index: {}]   ;;  %s271_s1 = inlined_call_operand.vmem [shape: f32[1,32], index: 1, kind: input, shape index: {}]   ;;  %s272_s2 = inlined_call_operand.vmem [shape: f32[1,32], index: 2, kind: input, shape index: {}]   ;;  %s273_s4 = inlined_call_operand.vmem [shape: f32[1,128], index: 4, kind: input, shape index: {}]   ;;  %s274_s5 = inlined_call_operand.vmem [shape: f32[16,128], index: 5, kind: output, shape index: {}]  }
   0x1   :  { %v20_v0 = vld [vmem:[%s269_s0] sm:$0xff]  ;;  %v21_v1 = vld [vmem:[%s269_s0 + $0x8] sm:$0xff]  ;;  %v70_v16 = vld [vmem:[%s270_s3 + $0x10] sm:$0xff] }
   0x2   :  { %v25_v2 = vsel %vm24_vm0, %v20_v0, 0.0  ;;  %v28_v3 = vsel %vm24_vm0, %v21_v1, 0.0  ;;  %v68_v14 = vld [vmem:[%s270_s3] sm:$0xff]  ;;  %v69_v15 = vld [vmem:[%s270_s3 + $0x8] sm:$0xff]  ;;  %v71_v18 = vld [vmem:[%s270_s3 + $0x18] sm:$0xff] }
   0x3   :  { %26 = vadd.xlane.f32.xlu0 %v25_v2  ;;  %v188_v17 = vpack.c.bf16 %v69_v15, %v68_v14  ;;  %v192_v19 = vpack.c.bf16 %v71_v18, %v70_v16  ;;  %v166_v27 = vld [vmem:[%s271_s1] ss:$0 sm:$0xff] }
   0x4   :  { %v167_v29 = vld [vmem:[%s272_s2] ss:$0 sm:$0xff] }
   0x5   :  { %189 = vmatprep.subr.bf16.mxu0 %v188_v17  ;;  %v168_v36 = vld [vmem:[%s273_s4] ss:$0 sm:$0xff] }
   0x6   :  { %191 = vmatpush3.bf16.msra.mxu0 %v188_v17 }
   0x7   :  { %29 = vadd.xlane.f32.xlu0 %v28_v3  ;;  %193 = vmatprep.subr.bf16.mxu0 %v192_v19 }
   0xa   :  { %195 = vmatpush3.bf16.msra.mxu0 %v192_v19 }
  0x90   :  { %v27_v4 = vpop.xlane.xlu0 %26 }
  0x91   :  { %v32_v5 = vmul.f32 0.03125, %v27_v4 }
  0x93   :  { %v34_v6 = vsub.f32 %v20_v0, %v32_v5 }
  0x94   :  { %v30_v7 = vpop.xlane.xlu0 %29 }
  0x95   :  { %v33_v8 = vmul.f32 0.03125, %v30_v7  ;;  %v36_v9 = vmul.f32 %v34_v6, %v34_v6 }
  0x97   :  { %v35_v10 = vsub.f32 %v21_v1, %v33_v8  ;;  %v38_v11 = vsel %vm24_vm0, %v36_v9, 0.0 }
  0x98   :  { %39 = vadd.xlane.f32.xlu1 %v38_v11 }
  0x99   :  { %v37_v12 = vmul.f32 %v35_v10, %v35_v10 }
  0x9b   :  { %v41_v13 = vsel %vm24_vm0, %v37_v12, 0.0 }
  0x9c   :  { %42 = vadd.xlane.f32.xlu1 %v41_v13 }
 0x125   :  { %v40_v20 = vpop.xlane.xlu1 %39 }
 0x126   :  { %v44_v21 = vmul.f32 0.03125, %v40_v20 }
 0x128   :  { %v46_v22 = vadd.f32 1e-05, %v44_v21 }
 0x129   :  { %v43_v23 = vpop.xlane.xlu1 %42 }
 0x12a   :  { %196 = vrsqrt.f32 %v46_v22  ;;  %v45_v24 = vmul.f32 0.03125, %v43_v23 }
 0x12c   :  { %v47_v25 = vadd.f32 1e-05, %v45_v24 }
 0x12e   :  { %198 = vrsqrt.f32 %v47_v25 }
 0x134   :  { %v197_v26 = vpop.eup %196 }
 0x135   :  { %v50_v28 = vmul.f32 %v197_v26, %v34_v6 }
 0x137   :  { %v58_v30 = vmul.f32 %v166_v27, %v50_v28 }
 0x138   :  { %v199_v31 = vpop.eup %198 }
 0x139   :  { %v51_v32 = vmul.f32 %v199_v31, %v35_v10  ;;  %v66_v33 = vadd.f32 %v167_v29, %v58_v30 }
 0x13b   :  { %v59_v34 = vmul.f32 %v166_v27, %v51_v32  ;;  %185 = vmatprep.mubr.msk.f32.mxu0 %vm24_vm0, %v66_v33 }
 0x13d   :  { %v67_v35 = vadd.f32 %v167_v29, %v59_v34 }
 0x13f   :  { %186 = vmatmul.mubr.msk.f32.vlgmr.msra.gmra.mrb[0].mxu0 %vm24_vm0, %v67_v35 }
 0x212   :  { %v187_v37 = vpop.f32.mrb[0].mxu0 }
 0x213   :  { %v157_v38 = vadd.f32 %v187_v37, %v168_v36  ;;  %v151_v39 = vpop.f32.mrb[1].mxu0 }
 0x214   :  { %v152_v40 = vadd.f32 %v168_v36, %v151_v39 }
 0x215   :  { %161 = vst [vmem:[%s274_s5 + $0x8] sm:$0xff] %v157_v38 }
 0x216   :  { %160 = vst [vmem:[%s274_s5] sm:$0xff] %v152_v40 }

// kernel: lstm_block_forward.5
= control target key start
LH: loop header
LB: loop body
LE: loop exit
PB: predicated region body
PF: predicated region fallthrough
CT: control target
= control target key end

     0   :  { %vm40_vm0 = vcmask 261120   ;;  %s641_s0 = inlined_call_operand.vmem [shape: f32[16,32], index: 0, kind: input, shape index: {}]   ;;  %s642_s1 = inlined_call_operand.vmem [shape: f32[16,32], index: 1, kind: input, shape index: {}]   ;;  %s643_s2 = inlined_call_operand.vmem [shape: f32[1,32], index: 2, kind: input, shape index: {}]   ;;  %s644_s3 = inlined_call_operand.vmem [shape: f32[1,32], index: 3, kind: input, shape index: {}]   ;;  %s645_s4 = inlined_call_operand.vmem [shape: f32[32,128], index: 4, kind: input, shape index: {}]   ;;  %s646_s5 = inlined_call_operand.vmem [shape: f32[1,128], index: 5, kind: input, shape index: {}]   ;;  %s647_s6 = inlined_call_operand.vmem [shape: f32[128,32], index: 6, kind: input, shape index: {}]   ;;  %s648_s7 = inlined_call_operand.vmem [shape: f32[1,32], index: 7, kind: input, shape index: {}]   ;;  %s649_s8 = inlined_call_operand.hbm [shape: f32[16,32], index: 8, kind: output, shape index: {}]  }
   0x1   :  { %v34_v0 = vld [vmem:[%s641_s0] sm:$0xff]  ;;  %v35_v2 = vld [vmem:[%s641_s0 + $0x8] sm:$0xff] }
   0x2   :  { %v36_v1 = vld [vmem:[%s642_s1] sm:$0xff]  ;;  %v37_v4 = vld [vmem:[%s642_s1 + $0x8] sm:$0xff] }
   0x3   :  { %v38_v3 = vadd.f32 %v36_v1, %v34_v0 }
   0x4   :  { %13 = vsyncpa [#allocation6], 0  ;;  %v39_v5 = vadd.f32 %v37_v4, %v35_v2  ;;  %v94_v18 = vld [vmem:[%s645_s4] sm:$0xff]  ;;  %v95_v19 = vld [vmem:[%s645_s4 + $0x8] sm:$0xff]  ;;  %v470_v2 = vmov 0.0   ;;  %s471_s29 = smov [#allocation5]  }
   0x5   :  { %v45_v6 = vsel %vm40_vm0, %v38_v3, 0.0  ;;  %41 = vst.msk [vmem:[#allocation2] sm:$0xff] %vm40_vm0, %v38_v3  ;;  %v398_v20 = vpack.c.bf16 %v95_v19, %v94_v18  ;;  %v96_v21 = vld [vmem:[%s645_s4 + $0x10] sm:$0xff]  ;;  %v97_v22 = vld [vmem:[%s645_s4 + $0x18] sm:$0xff]  ;;  %v191_v24 = vld [vmem:[%s647_s6] sm:$0xff]  ;;  %s311_s30 = sshll.u32 %s471_s29, 4  ;;  %s312_s30 = int_to_ptr.vmem [resolvable:$true] %s311_s30 }
   0x6   :  { %46 = vadd.xlane.f32.xlu0 %v45_v6  ;;  %42 = vst.msk [vmem:[#allocation2 + $0x8] sm:$0xff] %vm40_vm0, %v39_v5  ;;  %v48_v7 = vsel %vm40_vm0, %v39_v5, 0.0  ;;  %v402_v23 = vpack.c.bf16 %v97_v22, %v96_v21  ;;  %v192_v25 = vld [vmem:[%s647_s6 + $0x8] sm:$0xff]  ;;  %v193_v26 = vld [vmem:[%s647_s6 + $0x10] sm:$0xff]  ;;  %v194_v28 = vld [vmem:[%s647_s6 + $0x18] sm:$0xff]  ;;  %s446_s9 = scalar_lea.vmem %s312_s30, 256  ;;  %p451_p1 = scmp.lt.s32.totalorder %s312_s30, %s312_s30 }
   0x7   :  { %399 = vmatprep.subr.bf16.mxu0 %v398_v20  ;;  %v406_v27 = vpack.c.bf16 %v192_v25, %v191_v24  ;;  %v410_v29 = vpack.c.bf16 %v194_v28, %v193_v26  ;;  %v195_v30 = vld [vmem:[%s647_s6 + $0x20] sm:$0xff]  ;;  %v196_v31 = vld [vmem:[%s647_s6 + $0x28] sm:$0xff]  ;;  %v197_v33 = vld [vmem:[%s647_s6 + $0x30] sm:$0xff]  ;;  %91 = vst.msk [vmem:[#allocation4 + $0x8] sm:$0xff] %vm40_vm0, %v470_v2  ;;  %p447_p0 = scmp.ne.s32.totalorder %s312_s30, %s446_s9  ;;  %p452_p2 = scmp.lt.s32.totalorder %s446_s9, %s446_s9 }
   0x8   :  { %401 = vmatpush3.bf16.msra.mxu0 %v398_v20  ;;  %v414_v32 = vpack.c.bf16 %v196_v31, %v195_v30  ;;  %v198_v34 = vld [vmem:[%s647_s6 + $0x38] sm:$0xff]  ;;  %v199_v36 = vld [vmem:[%s647_s6 + $0x40] sm:$0xff]  ;;  %v200_v37 = vld [vmem:[%s647_s6 + $0x48] sm:$0xff]  ;;  %90 = vst.msk [vmem:[#allocation4] sm:$0xff] %vm40_vm0, %v470_v2 }
   0x9   :  { %403 = vmatprep.subr.bf16.mxu0 %v402_v23  ;;  %407 = vmatprep.subr.bf16.mxu1 %v406_v27  ;;  %v418_v35 = vpack.c.bf16 %v198_v34, %v197_v33  ;;  %v422_v38 = vpack.c.bf16 %v200_v37, %v199_v36  ;;  %v201_v39 = vld [vmem:[%s647_s6 + $0x50] sm:$0xff]  ;;  %v202_v40 = vld [vmem:[%s647_s6 + $0x58] sm:$0xff]  ;;  %v203_v42 = vld [vmem:[%s647_s6 + $0x60] sm:$0xff]  ;;  %p453_p3 = por %p452_p2, %p451_p1 }
   0xa   :  { %49 = vadd.xlane.f32.xlu0 %v48_v7  ;;  %409 = vmatpush3.bf16.msra.mxu1 %v406_v27  ;;  %v426_v41 = vpack.c.bf16 %v202_v40, %v201_v39  ;;  %v204_v43 = vld [vmem:[%s647_s6 + $0x68] sm:$0xff]  ;;  %v322_v52 = vld [vmem:[%s643_s2] ss:$0 sm:$0xff]  ;;  %v205_v63 = vld [vmem:[%s647_s6 + $0x70] sm:$0xff] }
   0xb   :  { %411 = vmatprep.subr.bf16.mxu1 %v410_v29  ;;  %v430_v44 = vpack.c.bf16 %v204_v43, %v203_v42  ;;  %v323_v54 = vld [vmem:[%s644_s3] ss:$0 sm:$0xff]  ;;  %v206_v0 = vld [vmem:[%s647_s6 + $0x78] sm:$0xff]  ;;  %p454_p4 = pnand %p453_p3, %p447_p0 }
   0xc   :  { %405 = vmatpush3.bf16.msra.mxu0 %v402_v23  ;;  %v434_v1 = vpack.c.bf16 %v206_v0, %v205_v63  ;;  %v327_v19 = vld [vmem:[%s648_s7] ss:$0 sm:$0xff] }
   0xe   :  { %413 = vmatpush3.bf16.msra.mxu1 %v410_v29 }
   0xf   :  { %415 = vmatprep.subr.bf16.mxu1 %v414_v32 }
  0x12   :  { %417 = vmatpush3.bf16.msra.mxu1 %v414_v32 }
  0x13   :  { %419 = vmatprep.subr.bf16.mxu1 %v418_v35 }
  0x16   :  { %421 = vmatpush3.bf16.msra.mxu1 %v418_v35 }
  0x17   :  { %423 = vmatprep.subr.bf16.mxu1 %v422_v38 }
  0x1a   :  { %425 = vmatpush3.bf16.msra.mxu1 %v422_v38 }
  0x1b   :  { %427 = vmatprep.subr.bf16.mxu1 %v426_v41 }
  0x1e   :  { %429 = vmatpush3.bf16.msra.mxu1 %v426_v41 }
  0x1f   :  { %431 = vmatprep.subr.bf16.mxu1 %v430_v44 }
  0x22   :  { %433 = vmatpush3.bf16.msra.mxu1 %v430_v44 }
  0x23   :  { %435 = vmatprep.subr.bf16.mxu1 %v434_v1 }
  0x26   :  { %437 = vmatpush3.bf16.msra.mxu1 %v434_v1 }
  0x93   :  { %v47_v8 = vpop.xlane.xlu0 %46 }
  0x94   :  { %v52_v9 = vmul.f32 0.03125, %v47_v8 }
  0x96   :  { %v535_v10 = vsub.f32 %v38_v3, %v52_v9  ;;  %v324_v3 = vld [vmem:[%s646_s5] ss:$0 sm:$0xff] }
  0x97   :  { %v50_v11 = vpop.xlane.xlu0 %49 }
  0x98   :  { %v53_v12 = vmul.f32 0.03125, %v50_v11  ;;  %v56_v13 = vmul.f32 %v535_v10, %v535_v10  ;;  %v189_v11 = vld [vmem:[#allocation4] sm:$0xff] }
  0x9a   :  { %v539_v14 = vsub.f32 %v39_v5, %v53_v12  ;;  %v58_v15 = vsel %vm40_vm0, %v56_v13, 0.0 }
  0x9b   :  { %59 = vadd.xlane.f32.xlu1 %v58_v15 }
  0x9c   :  { %v57_v16 = vmul.f32 %v539_v14, %v539_v14 }
  0x9e   :  { %v61_v17 = vsel %vm40_vm0, %v57_v16, 0.0  ;;  %v290_v16 = vld [vmem:[#allocation2 + $0x8] sm:$0xff] }
  0x9f   :  { %62 = vadd.xlane.f32.xlu1 %v61_v17  ;;  %v289_v17 = vld [vmem:[#allocation2] sm:$0xff] }
 0x128   :  { %v60_v45 = vpop.xlane.xlu1 %59 }
 0x129   :  { %v64_v46 = vmul.f32 0.03125, %v60_v45 }
 0x12b   :  { %v66_v47 = vadd.f32 1e-05, %v64_v46 }
 0x12c   :  { %v63_v48 = vpop.xlane.xlu1 %62 }
 0x12d   :  { %442 = vrsqrt.f32 %v66_v47  ;;  %v65_v49 = vmul.f32 0.03125, %v63_v48 }
 0x12f   :  { %v67_v50 = vadd.f32 1e-05, %v65_v49 }
 0x131   :  { %444 = vrsqrt.f32 %v67_v50 }
 0x137   :  { %v443_v51 = vpop.eup %442 }
 0x138   :  { %v70_v53 = vmul.f32 %v443_v51, %v535_v10  ;;  %v190_v10 = vld [vmem:[#allocation4 + $0x8] sm:$0xff] }
 0x13a   :  { %v78_v55 = vmul.f32 %v322_v52, %v70_v53 }
 0x13b   :  { %v445_v56 = vpop.eup %444 }
 0x13c   :  { %v86_v57 = vadd.f32 %v323_v54, %v78_v55  ;;  %v71_v58 = vmul.f32 %v445_v56, %v539_v14 }
 0x13e   :  { %88 = vst.msk [vmem:[#allocation3] sm:$0xff] %vm40_vm0, %v86_v57  ;;  %v79_v59 = vmul.f32 %v322_v52, %v71_v58 }
 0x140   :  { %v87_v60 = vadd.f32 %v323_v54, %v79_v59 }
 0x142   :  { %89 = vst.msk [vmem:[#allocation3 + $0x8] sm:$0xff] %vm40_vm0, %v87_v60 }
 0x145   :  { %v92_v61 = vld [vmem:[#allocation3] sm:$0xff] }
 0x146   :  { %360 = vmatprep.mubr.msk.f32.mxu0 %vm40_vm0, %v92_v61 }
 0x149   :  { %v93_v62 = vld [vmem:[#allocation3 + $0x8] sm:$0xff] }
 0x14a   :  { %361 = vmatmul.mubr.msk.f32.vlgmr.msra.gmra.mrb[0].mxu0 %vm40_vm0, %v93_v62 }
 0x21d   :  { %v362_v4 = vpop.f32.mrb[0].mxu0 }
 0x21e   :  { %v184_v5 = vadd.f32 %v362_v4, %v324_v3  ;;  %v178_v6 = vpop.f32.mrb[1].mxu0 }
 0x21f   :  { %v179_v7 = vadd.f32 %v324_v3, %v178_v6 }
 0x220   :  { %v188_v9 = vmax.f32 %v184_v5, 0.0 }
 0x221   :  { %v187_v8 = vmax.f32 %v179_v7, 0.0 }
 0x223   :  { %395 = vmatprep.mubr.f32.mxu1 %v187_v8 }
 0x224   :  { %396 = vmatmul.mubr.f32.vlgmr.msra.gmra.mrb[0].mxu1 %v188_v9 }
 0x2f7   :  { %v397_v12 = vpop.f32.mrb[0].mxu1 }
 0x2f8   :  { %v283_v13 = vadd.f32 %v397_v12, %v190_v10  ;;  %v273_v14 = vpop.f32.mrb[1].mxu1 }
 0x2f9   :  { %v282_v15 = vadd.f32 %v273_v14, %v189_v11 }
 0x2fa   :  { %285 = vst.msk [vmem:[#allocation4 + $0x8] sm:$0xff] %vm40_vm0, %v283_v13 }
 0x2fb   :  { %284 = vst.msk [vmem:[#allocation4] sm:$0xff] %vm40_vm0, %v282_v15 }
 0x301   :  { %v292_v18 = vld [vmem:[#allocation4 + $0x8] sm:$0xff] }
 0x302   :  { %v291_v20 = vld [vmem:[#allocation4] sm:$0xff]  ;;  %v294_v21 = vadd.f32 %v292_v18, %v290_v16 }
 0x303   :  { %v293_v22 = vadd.f32 %v291_v20, %v289_v17 }
 0x304   :  { %v303_v23 = vadd.f32 %v327_v19, %v294_v21 }
 0x305   :  { %v302_v24 = vadd.f32 %v327_v19, %v293_v22 }
 0x306   :  { %305 = vst.msk [vmem:[#allocation5 + $0x8] sm:$0xff] %vm40_vm0, %v303_v23 }
 0x307   :  { %304 = vst.msk [vmem:[#allocation5] sm:$0xff] %vm40_vm0, %v302_v24 }
 0x308   :  { %457 = shalt.err (!%p454_p4)
}
 0x309   :  { %s458_s11 = scalar_lea.hbm %s649_s8, 256 }
 0x30a   :  { %p459_p5 = scmp.ne.s32.totalorder %s649_s8, %s458_s11  ;;  %p462_p6 = scmp.lt.u32.totalorder %s458_s11, %s649_s8 }
 0x30c   :  { %p464_p7 = pnand %p462_p6, %p459_p5 }
 0x30e   :  { %467 = shalt.err (!%p464_p7)
}
 0x30f   :  { %s472_s14 = smov 128   ;;  %s473_s15 = smov 8  }
 0x310   :  { %317 = dma.vmem_to_hbm [thread:$0]  %s312_s30, 256, %s649_s8, [#allocation6], %s472_s14, %s472_s14, %s473_s15  }
 0x311   :  { %468 = dma.done.wait [#allocation6], 256  }
 0x312   :  { %469 = vsyncadd [#allocation6], 4294967040 }
 0x313   :  { %321 = vsyncpa [#allocation6], 1 }

// kernel: lstm_block_forward.4
= control target key start
LH: loop header
LB: loop body
LE: loop exit
PB: predicated region body
PF: predicated region fallthrough
CT: control target
= control target key end

     0   :  { %vm15_vm0 = vcmask 254976   ;;  %v1219_v0 = vmov 0.0|0.0   ;;  %vm1220_vm1 = vmmov 0   ;;  %v1221_v4 = vmov 0.0   ;;  %s1222_s18 = smov 64   ;;  %s1223_s19 = smov 32   ;;  %s1414_s1 = inlined_call_operand.vmem [shape: f32[32,128], index: 1, kind: input, shape index: {}]   ;;  %s1415_s0 = inlined_call_operand.vmem [shape: f32[2,1024], index: 0, kind: input, shape index: {}]   ;;  %s1416_s2 = inlined_call_operand.vmem [shape: f32[2,256], index: 2, kind: output, shape index: {}]  }
   0x1   :  { %1116 = vmatprep.subr.bf16.mxu0 %v1219_v0  ;;  %v18_v1 = vld [vmem:[%s1414_s1] sm:$0xff]  ;;  %v19_v2 = vld [vmem:[%s1414_s1 + $0x8] sm:$0xff]  ;;  %v20_v3 = vld [vmem:[%s1414_s1 + $0x10] sm:$0xff]  ;;  %1036 = vmatprep.mubr.msk.f32.mxu0 %vm1220_vm1, %v1221_v4  ;;  %16 = vst.msk [vmem:[#allocation2] sm:$0x3] %vm15_vm0, %v1221_v4  ;;  %vm25_vm2 = vcmask 261120   ;;  %v141_v29 = vlaneseq }
   0x2   :  { %17 = vst.msk [vmem:[#allocation3] sm:$0x3] %vm15_vm0, %v1221_v4  ;;  %v1257_v5 = vpack.c.bf16 %v19_v2, %v18_v1  ;;  %v21_v6 = vld [vmem:[%s1414_s1 + $0x18] sm:$0xff]  ;;  %1122 = vmatprep.subr.bf16.mxu1 %v1219_v0  ;;  %1047 = vmatprep.mubr.msk.f32.mxu1 %vm1220_vm1, %v1221_v4  ;;  %v24_v9 = vld [vmem:[%s1415_s0] sm:$0x3]  ;;  %vm914_vm3 = vcmask 523264  }
   0x3   :  { %v1266_v7 = vpack.c.bf16 %v21_v6, %v20_v3  ;;  %v1224_v27 = vmov 1983009808   ;;  %v142_v31 = vshrl.u32 %v141_v29, 7  ;;  %v136_v37 = vld [vmem:[%s1415_s0 + $0x2] sm:$0x3]  ;;  %vm916_vm4 = vcmask 785408  }
   0x4   :  { %1118 = vmatpush3.bf16.msra.mxu0 %v1257_v5  ;;  %1124 = vmatpush3.bf16.msra.mxu1 %v1257_v5  ;;  %v139_v28 = vunpack.c.l.s4 %v1224_v27  ;;  %v245_v57 = vld [vmem:[%s1415_s0 + $0x4] sm:$0x3] }
   0x5   :  { %1119 = vmatprep.subr.bf16.mxu0 %v1219_v0  ;;  %1125 = vmatprep.subr.bf16.mxu1 %v1219_v0 }
   0x6   :  { %v140_v30 = vunpack.c.0.s8 %v139_v28 }
   0x8   :  { %1121 = vmatpush3.bf16.msra.mxu0 %v1266_v7  ;;  %v22_v8 = vld [vmem:[#allocation2] sm:$0x3]  ;;  %1127 = vmatpush3.bf16.msra.mxu1 %v1266_v7  ;;  %v1289_v32 = vsub.s32 %v140_v30, %v142_v31 }
   0x9   :  { %1128 = vmatprep.subr.bf16.mxu0 %v1219_v0  ;;  %1134 = vmatprep.subr.bf16.mxu1 %v1219_v0  ;;  %v965_v19 = vld.sshfl [vmem:[#allocation3] sm:$0x3 pattern:$0x76325410] }
   0xb   :  { %1037 = vmatmul.mubr.msk.f32.vlgmr.msra.gmra.mrb[0].mxu0 %vm25_vm2, %v22_v8 }
   0xc   :  { %1130 = vmatpush3.bf16.msra.mxu0 %v1257_v5  ;;  %1058 = vmatprep.mubr.msk.f32.mxu0 %vm1220_vm1, %v1221_v4 }
   0xd   :  { %1131 = vmatprep.subr.bf16.mxu0 %v1219_v0 }
  0x10   :  { %1133 = vmatpush3.bf16.msra.mxu0 %v1266_v7 }
  0x11   :  { %1140 = vmatprep.subr.bf16.mxu0 %v1219_v0 }
  0xde   :  { %v95_v10 = vpop.f32.mrb[0].mxu0 }
  0xdf   :  { %v99_v11 = vadd.f32 %v95_v10, %v24_v9  ;;  %v1038_v12 = vpop.f32.mrb[1].mxu0 }
  0xe1   :  { %v963_v13 = vmul.f32 -1.442695, %v99_v11 }
  0xe3   :  { %1171 = vpow2.f32 %v963_v13 }
  0xed   :  { %v1172_v14 = vpop.eup %1171 }
  0xee   :  { %v103_v15 = vadd.f32 1.0, %v1172_v14 }
  0xf0   :  { %1173 = vrcp.f32 %v103_v15 }
  0xfa   :  { %v1174_v16 = vpop.eup %1173 }
  0xfb   :  { %v106_v17 = vmul.f32 2.0, %v1174_v16 }
  0xfd   :  { %v964_v18 = vadd.f32 -1.0, %v106_v17  ;;  %v354_v17 = vld [vmem:[%s1415_s0 + $0x6] sm:$0x3] }
  0xff   :  { %121 = vrot.lane.b32.xlu0 %v964_v18, %s1222_s18 }
 0x103   :  { %116 = vrot.lane.b32.xlu0 %v965_v19, %s1223_s19 }
 0x171   :  { %v122_v20 = vpop.permute.xlu0 %121 }
 0x172   :  { %v124_v21 = vmul.f32 %v1174_v16, %v122_v20 }
 0x174   :  { %126 = vrot.lane.b32.xlu1 %v124_v21, %s1223_s19 }
 0x175   :  { %v117_v22 = vpop.permute.xlu0 %116 }
 0x176   :  { %v119_v23 = vmul.f32 %v1174_v16, %v117_v22 }
 0x1e6   :  { %v127_v24 = vpop.permute.xlu1 %126 }
 0x1e7   :  { %v129_v25 = vadd.f32 %v127_v24, %v119_v23 }
 0x1e9   :  { %1175 = vtanh.f32 %v129_v25 }
 0x1f3   :  { %v1176_v26 = vpop.eup %1175 }
 0x1f4   :  { %132 = vrot.lane.b32.xlu1 %v1176_v26, %s1222_s18 }
 0x266   :  { %v133_v33 = vpop.permute.xlu1 %132 }
 0x267   :  { %v135_v34 = vmul.f32 %v1174_v16, %v133_v33 }
 0x269   :  { %v144_v35 = vrot.slane %v135_v34, %v1289_v32 }
 0x26b   :  { %145 = vrot.lane.b32.xlu0 %v144_v35, %s1223_s19 }
 0x2dd   :  { %v1293_v36 = vpop.permute.xlu0 %145 }
 0x2de   :  { %1048 = vmatmul.mubr.msk.f32.vlgmr.msra.gmra.mrb[0].mxu1 %vm25_vm2, %v1293_v36 }
 0x2df   :  { %1136 = vmatpush3.bf16.msra.mxu1 %v1257_v5  ;;  %1069 = vmatprep.mubr.msk.f32.mxu1 %vm1220_vm1, %v1221_v4 }
 0x2e0   :  { %1137 = vmatprep.subr.bf16.mxu1 %v1219_v0 }
 0x2e3   :  { %1139 = vmatpush3.bf16.msra.mxu1 %v1266_v7 }
 0x2e4   :  { %1146 = vmatprep.subr.bf16.mxu1 %v1219_v0 }
 0x3b1   :  { %v215_v38 = vpop.f32.mrb[0].mxu1 }
 0x3b2   :  { %v219_v39 = vadd.f32 %v215_v38, %v136_v37  ;;  %v1049_v40 = vpop.f32.mrb[1].mxu1 }
 0x3b4   :  { %v967_v41 = vmul.f32 -1.442695, %v219_v39  ;;  %v463_v39 = vld [vmem:[%s1415_s0 + $0x8] sm:$0x3] }
 0x3b6   :  { %1177 = vpow2.f32 %v967_v41 }
 0x3c0   :  { %v1178_v42 = vpop.eup %1177 }
 0x3c1   :  { %v223_v43 = vadd.f32 1.0, %v1178_v42 }
 0x3c3   :  { %1179 = vrcp.f32 %v223_v43 }
 0x3cd   :  { %v1180_v44 = vpop.eup %1179 }
 0x3ce   :  { %v226_v45 = vmul.f32 2.0, %v1180_v44  ;;  %v228_v49 = vmul.f32 %v1180_v44, %v129_v25 }
 0x3d0   :  { %v968_v46 = vadd.f32 -1.0, %v226_v45 }
 0x3d2   :  { %230 = vrot.lane.b32.xlu1 %v968_v46, %s1222_s18 }
 0x444   :  { %v231_v47 = vpop.permute.xlu1 %230 }
 0x445   :  { %v233_v48 = vmul.f32 %v1180_v44, %v231_v47 }
 0x447   :  { %235 = vrot.lane.b32.xlu0 %v233_v48, %s1223_s19 }
 0x4b9   :  { %v236_v50 = vpop.permute.xlu0 %235 }
 0x4ba   :  { %v238_v51 = vadd.f32 %v236_v50, %v228_v49 }
 0x4bc   :  { %1181 = vtanh.f32 %v238_v51 }
 0x4c6   :  { %v1182_v52 = vpop.eup %1181 }
 0x4c7   :  { %241 = vrot.lane.b32.xlu1 %v1182_v52, %s1222_s18 }
 0x539   :  { %v242_v53 = vpop.permute.xlu1 %241 }
 0x53a   :  { %v244_v54 = vmul.f32 %v1180_v44, %v242_v53 }
 0x53c   :  { %v1310_v55 = vrot.slane %v244_v54, %v1289_v32 }
 0x53e   :  { %254 = vrot.lane.b32.xlu0 %v1310_v55, %s1223_s19 }
 0x5b0   :  { %v255_v56 = vpop.permute.xlu0 %254 }
 0x5b1   :  { %1059 = vmatmul.mubr.msk.f32.vlgmr.msra.gmra.mrb[2].mxu0 %vm25_vm2, %v255_v56 }
 0x5b2   :  { %1142 = vmatpush3.bf16.msra.mxu0 %v1257_v5  ;;  %1080 = vmatprep.mubr.msk.f32.mxu0 %vm1220_vm1, %v1221_v4 }
 0x5b3   :  { %1143 = vmatprep.subr.bf16.mxu0 %v1219_v0 }
 0x5b6   :  { %1145 = vmatpush3.bf16.msra.mxu0 %v1266_v7 }
 0x5b7   :  { %1152 = vmatprep.subr.bf16.mxu0 %v1219_v0 }
 0x684   :  { %v324_v58 = vpop.f32.mrb[2].mxu0 }
 0x685   :  { %v328_v59 = vadd.f32 %v324_v58, %v245_v57  ;;  %v1060_v60 = vpop.f32.mrb[3].mxu0 }
 0x686   :  { %v572_v60 = vld [vmem:[%s1415_s0 + $0xa] sm:$0x3] }
 0x687   :  { %v970_v61 = vmul.f32 -1.442695, %v328_v59 }
 0x689   :  { %1183 = vpow2.f32 %v970_v61 }
 0x693   :  { %v1184_v62 = vpop.eup %1183 }
 0x694   :  { %v332_v63 = vadd.f32 1.0, %v1184_v62 }
 0x696   :  { %1185 = vrcp.f32 %v332_v63 }
 0x6a0   :  { %v1186_v1 = vpop.eup %1185 }
 0x6a1   :  { %v335_v2 = vmul.f32 2.0, %v1186_v1  ;;  %v337_v9 = vmul.f32 %v1186_v1, %v238_v51 }
 0x6a3   :  { %v971_v3 = vadd.f32 -1.0, %v335_v2 }
 0x6a5   :  { %339 = vrot.lane.b32.xlu1 %v971_v3, %s1222_s18 }
 0x717   :  { %v340_v6 = vpop.permute.xlu1 %339 }
 0x718   :  { %v342_v8 = vmul.f32 %v1186_v1, %v340_v6 }
 0x71a   :  { %344 = vrot.lane.b32.xlu0 %v342_v8, %s1223_s19 }
 0x78c   :  { %v345_v10 = vpop.permute.xlu0 %344 }
 0x78d   :  { %v347_v11 = vadd.f32 %v345_v10, %v337_v9 }
 0x78f   :  { %1187 = vtanh.f32 %v347_v11 }
 0x799   :  { %v1188_v12 = vpop.eup %1187 }
 0x79a   :  { %350 = vrot.lane.b32.xlu1 %v1188_v12, %s1222_s18 }
 0x80c   :  { %v351_v13 = vpop.permute.xlu1 %350 }
 0x80d   :  { %v353_v14 = vmul.f32 %v1186_v1, %v351_v13 }
 0x80f   :  { %v1328_v15 = vrot.slane %v353_v14, %v1289_v32 }
 0x811   :  { %363 = vrot.lane.b32.xlu0 %v1328_v15, %s1223_s19 }
 0x883   :  { %v364_v16 = vpop.permute.xlu0 %363 }
 0x884   :  { %1070 = vmatmul.mubr.msk.f32.vlgmr.msra.gmra.mrb[2].mxu1 %vm25_vm2, %v364_v16 }
 0x885   :  { %1148 = vmatpush3.bf16.msra.mxu1 %v1257_v5  ;;  %1091 = vmatprep.mubr.msk.f32.mxu1 %vm1220_vm1, %v1221_v4 }
 0x886   :  { %1149 = vmatprep.subr.bf16.mxu1 %v1219_v0 }
 0x889   :  { %1151 = vmatpush3.bf16.msra.mxu1 %v1266_v7 }
 0x88a   :  { %1158 = vmatprep.subr.bf16.mxu1 %v1219_v0 }
 0x957   :  { %v433_v18 = vpop.f32.mrb[2].mxu1 }
 0x958   :  { %v437_v19 = vadd.f32 %v433_v18, %v354_v17  ;;  %v1071_v20 = vpop.f32.mrb[3].mxu1  ;;  %v681_v17 = vld [vmem:[%s1415_s0 + $0xc] sm:$0x3] }
 0x95a   :  { %v973_v21 = vmul.f32 -1.442695, %v437_v19 }
 0x95c   :  { %1189 = vpow2.f32 %v973_v21 }
 0x966   :  { %v1190_v22 = vpop.eup %1189 }
 0x967   :  { %v441_v23 = vadd.f32 1.0, %v1190_v22 }
 0x969   :  { %1191 = vrcp.f32 %v441_v23 }
 0x973   :  { %v1192_v24 = vpop.eup %1191 }
 0x974   :  { %v444_v25 = vmul.f32 2.0, %v1192_v24  ;;  %v446_v29 = vmul.f32 %v1192_v24, %v347_v11 }
 0x976   :  { %v974_v26 = vadd.f32 -1.0, %v444_v25 }
 0x978   :  { %448 = vrot.lane.b32.xlu1 %v974_v26, %s1222_s18 }
 0x9ea   :  { %v449_v27 = vpop.permute.xlu1 %448 }
 0x9eb   :  { %v451_v28 = vmul.f32 %v1192_v24, %v449_v27 }
 0x9ed   :  { %453 = vrot.lane.b32.xlu0 %v451_v28, %s1223_s19 }
 0xa5f   :  { %v454_v30 = vpop.permute.xlu0 %453 }
 0xa60   :  { %v456_v31 = vadd.f32 %v454_v30, %v446_v29 }
 0xa62   :  { %1193 = vtanh.f32 %v456_v31 }
 0xa6c   :  { %v1194_v33 = vpop.eup %1193 }
 0xa6d   :  { %459 = vrot.lane.b32.xlu1 %v1194_v33, %s1222_s18 }
 0xadf   :  { %v460_v34 = vpop.permute.xlu1 %459 }
 0xae0   :  { %v1345_v35 = vmul.f32 %v1192_v24, %v460_v34 }
 0xae2   :  { %v471_v37 = vrot.slane %v1345_v35, %v1289_v32 }
 0xae4   :  { %472 = vrot.lane.b32.xlu0 %v471_v37, %s1223_s19 }
 0xb56   :  { %v473_v38 = vpop.permute.xlu0 %472 }
 0xb57   :  { %1081 = vmatmul.mubr.msk.f32.vlgmr.msra.gmra.mrb[4].mxu0 %vm25_vm2, %v473_v38 }
 0xb58   :  { %1154 = vmatpush3.bf16.msra.mxu0 %v1257_v5  ;;  %1102 = vmatprep.mubr.msk.f32.mxu0 %vm1220_vm1, %v1221_v4 }
 0xb59   :  { %1155 = vmatprep.subr.bf16.mxu0 %v1219_v0 }
 0xb5c   :  { %1157 = vmatpush3.bf16.msra.mxu0 %v1266_v7 }
 0xc2a   :  { %v542_v40 = vpop.f32.mrb[4].mxu0 }
 0xc2b   :  { %v546_v41 = vadd.f32 %v542_v40, %v463_v39  ;;  %v1082_v42 = vpop.f32.mrb[5].mxu0  ;;  %v790_v40 = vld [vmem:[%s1415_s0 + $0xe] sm:$0x3]  ;;  %s1225_s0 = smov 96  }
 0xc2d   :  { %v976_v43 = vmul.f32 -1.442695, %v546_v41 }
 0xc2f   :  { %1195 = vpow2.f32 %v976_v43 }
 0xc39   :  { %v1196_v44 = vpop.eup %1195 }
 0xc3a   :  { %v550_v45 = vadd.f32 1.0, %v1196_v44 }
 0xc3c   :  { %1197 = vrcp.f32 %v550_v45 }
 0xc46   :  { %v1198_v46 = vpop.eup %1197 }
 0xc47   :  { %v553_v47 = vmul.f32 2.0, %v1198_v46  ;;  %v555_v51 = vmul.f32 %v1198_v46, %v456_v31 }
 0xc49   :  { %v977_v48 = vadd.f32 -1.0, %v553_v47 }
 0xc4b   :  { %557 = vrot.lane.b32.xlu1 %v977_v48, %s1222_s18 }
 0xcbd   :  { %v558_v49 = vpop.permute.xlu1 %557 }
 0xcbe   :  { %v560_v50 = vmul.f32 %v1198_v46, %v558_v49 }
 0xcc0   :  { %562 = vrot.lane.b32.xlu0 %v560_v50, %s1223_s19 }
 0xd32   :  { %v563_v52 = vpop.permute.xlu0 %562 }
 0xd33   :  { %v565_v53 = vadd.f32 %v563_v52, %v555_v51 }
 0xd35   :  { %1199 = vtanh.f32 %v565_v53 }
 0xd3f   :  { %v1200_v54 = vpop.eup %1199 }
 0xd40   :  { %568 = vrot.lane.b32.xlu1 %v1200_v54, %s1222_s18 }
 0xdb2   :  { %v569_v56 = vpop.permute.xlu1 %568 }
 0xdb3   :  { %v571_v57 = vmul.f32 %v1198_v46, %v569_v56 }
 0xdb5   :  { %v580_v58 = vrot.slane %v571_v57, %v1289_v32 }
 0xdb7   :  { %581 = vrot.lane.b32.xlu0 %v580_v58, %s1223_s19 }
 0xe29   :  { %v1364_v59 = vpop.permute.xlu0 %581 }
 0xe2a   :  { %1092 = vmatmul.mubr.msk.f32.vlgmr.msra.gmra.mrb[4].mxu1 %vm25_vm2, %v1364_v59 }
 0xe2b   :  { %1160 = vmatpush3.bf16.msra.mxu1 %v1257_v5  ;;  %1113 = vmatprep.mubr.msk.f32.mxu1 %vm1220_vm1, %v1221_v4 }
 0xe2c   :  { %1161 = vmatprep.subr.bf16.mxu1 %v1219_v0 }
 0xe2f   :  { %1163 = vmatpush3.bf16.msra.mxu1 %v1266_v7 }
 0xefd   :  { %v651_v61 = vpop.f32.mrb[4].mxu1 }
 0xefe   :  { %v655_v62 = vadd.f32 %v651_v61, %v572_v60  ;;  %v1093_v63 = vpop.f32.mrb[5].mxu1 }
 0xf00   :  { %v979_v1 = vmul.f32 -1.442695, %v655_v62 }
 0xf02   :  { %1201 = vpow2.f32 %v979_v1 }
 0xf0c   :  { %v1202_v2 = vpop.eup %1201 }
 0xf0d   :  { %v659_v3 = vadd.f32 1.0, %v1202_v2 }
 0xf0f   :  { %1203 = vrcp.f32 %v659_v3 }
 0xf19   :  { %v1204_v5 = vpop.eup %1203 }
 0xf1a   :  { %v662_v6 = vmul.f32 2.0, %v1204_v5  ;;  %v664_v7 = vmul.f32 %v1204_v5, %v565_v53 }
 0xf1c   :  { %v980_v8 = vadd.f32 -1.0, %v662_v6 }
 0xf1e   :  { %666 = vrot.lane.b32.xlu1 %v980_v8, %s1222_s18 }
 0xf90   :  { %v667_v0 = vpop.permute.xlu1 %666 }
 0xf91   :  { %v669_v4 = vmul.f32 %v1204_v5, %v667_v0 }
 0xf93   :  { %671 = vrot.lane.b32.xlu0 %v669_v4, %s1223_s19 }
0x1005   :  { %v672_v9 = vpop.permute.xlu0 %671 }
0x1006   :  { %v674_v10 = vadd.f32 %v672_v9, %v664_v7 }
0x1008   :  { %1205 = vtanh.f32 %v674_v10 }
0x1012   :  { %v1206_v11 = vpop.eup %1205 }
0x1013   :  { %677 = vrot.lane.b32.xlu1 %v1206_v11, %s1222_s18 }
0x1085   :  { %v678_v12 = vpop.permute.xlu1 %677 }
0x1086   :  { %v680_v13 = vmul.f32 %v1204_v5, %v678_v12 }
0x1088   :  { %v689_v14 = vrot.slane %v680_v13, %v1289_v32 }
0x108a   :  { %690 = vrot.lane.b32.xlu0 %v689_v14, %s1223_s19 }
0x10fc   :  { %v691_v16 = vpop.permute.xlu0 %690 }
0x10fd   :  { %1103 = vmatmul.mubr.msk.f32.vlgmr.msra.gmra.mrb[6].mxu0 %vm25_vm2, %v691_v16 }
0x11d0   :  { %v760_v18 = vpop.f32.mrb[6].mxu0 }
0x11d1   :  { %v764_v19 = vadd.f32 %v760_v18, %v681_v17  ;;  %v1104_v20 = vpop.f32.mrb[7].mxu0 }
0x11d3   :  { %v982_v21 = vmul.f32 -1.442695, %v764_v19 }
0x11d5   :  { %1207 = vpow2.f32 %v982_v21 }
0x11df   :  { %v1208_v22 = vpop.eup %1207 }
0x11e0   :  { %v768_v23 = vadd.f32 1.0, %v1208_v22 }
0x11e2   :  { %1209 = vrcp.f32 %v768_v23 }
0x11ec   :  { %v1210_v24 = vpop.eup %1209 }
0x11ed   :  { %v771_v25 = vmul.f32 2.0, %v1210_v24  ;;  %v773_v29 = vmul.f32 %v1210_v24, %v674_v10 }
0x11ef   :  { %v983_v26 = vadd.f32 -1.0, %v771_v25 }
0x11f1   :  { %775 = vrot.lane.b32.xlu1 %v983_v26, %s1222_s18 }
0x1263   :  { %v776_v27 = vpop.permute.xlu1 %775 }
0x1264   :  { %v778_v28 = vmul.f32 %v1210_v24, %v776_v27 }
0x1266   :  { %780 = vrot.lane.b32.xlu0 %v778_v28, %s1223_s19 }
0x12d8   :  { %v781_v30 = vpop.permute.xlu0 %780 }
0x12d9   :  { %v783_v31 = vadd.f32 %v781_v30, %v773_v29 }
0x12db   :  { %1211 = vtanh.f32 %v783_v31 }
0x12e5   :  { %v1212_v33 = vpop.eup %1211 }
0x12e6   :  { %786 = vrot.lane.b32.xlu1 %v1212_v33, %s1222_s18 }
0x1358   :  { %v787_v34 = vpop.permute.xlu1 %786 }
0x1359   :  { %v789_v37 = vmul.f32 %v1210_v24, %v787_v34 }
0x135b   :  { %v798_v38 = vrot.slane %v789_v37, %v1289_v32 }
0x135d   :  { %799 = vrot.lane.b32.xlu0 %v798_v38, %s1223_s19 }
0x13cf   :  { %v800_v39 = vpop.permute.xlu0 %799 }
0x13d0   :  { %1114 = vmatmul.mubr.msk.f32.vlgmr.msra.gmra.mrb[6].mxu1 %vm25_vm2, %v800_v39 }
0x14a3   :  { %v869_v41 = vpop.f32.mrb[6].mxu1 }
0x14a4   :  { %v873_v42 = vadd.f32 %v869_v41, %v790_v40  ;;  %v1115_v43 = vpop.f32.mrb[7].mxu1 }
0x14a6   :  { %v985_v44 = vmul.f32 -1.442695, %v873_v42 }
0x14a8   :  { %1213 = vpow2.f32 %v985_v44 }
0x14b2   :  { %v1214_v45 = vpop.eup %1213 }
0x14b3   :  { %v877_v46 = vadd.f32 1.0, %v1214_v45 }
0x14b5   :  { %1215 = vrcp.f32 %v877_v46 }
0x14bf   :  { %v1216_v47 = vpop.eup %1215 }
0x14c0   :  { %v880_v48 = vmul.f32 2.0, %v1216_v47  ;;  %v882_v52 = vmul.f32 %v1216_v47, %v783_v31 }
0x14c2   :  { %v986_v49 = vadd.f32 -1.0, %v880_v48 }
0x14c4   :  { %884 = vrot.lane.b32.xlu1 %v986_v49, %s1222_s18 }
0x1536   :  { %v885_v50 = vpop.permute.xlu1 %884 }
0x1537   :  { %v887_v51 = vmul.f32 %v1216_v47, %v885_v50 }
0x1539   :  { %889 = vrot.lane.b32.xlu0 %v887_v51, %s1223_s19 }
0x153d   :  { %900 = vrot.lane.b32.xlu0 %v1310_v55, %s1222_s18 }
0x1541   :  { %903 = vrot.lane.b32.xlu0 %v1328_v15, %s1225_s0 }
0x15ab   :  { %v890_v53 = vpop.permute.xlu0 %889 }
0x15ac   :  { %v892_v54 = vadd.f32 %v890_v53, %v882_v52 }
0x15ae   :  { %1217 = vtanh.f32 %v892_v54  ;;  %v953_v57 = vrot.slane %v892_v54, %v1289_v32 }
0x15af   :  { %v901_v58 = vpop.permute.xlu0 %900 }
0x15b0   :  { %v913_v63 = vsel %vm25_vm2, %v1293_v36, %v901_v58 }
0x15b3   :  { %v904_v15 = vpop.permute.xlu0 %903 }
0x15b4   :  { %v915_v1 = vsel %vm914_vm3, %v913_v63, %v904_v15 }
0x15b5   :  { %v917_v6 = vsel %vm916_vm4, %v915_v1, %v1345_v35 }
0x15b8   :  { %v1218_v56 = vpop.eup %1217 }
0x15b9   :  { %895 = vrot.lane.b32.xlu1 %v1218_v56, %s1222_s18 }
0x15bd   :  { %907 = vrot.lane.b32.xlu1 %v689_v14, %s1222_s18 }
0x15c1   :  { %910 = vrot.lane.b32.xlu1 %v798_v38, %s1225_s0 }
0x15c5   :  { %954 = vrot.lane.b32.xlu1 %v953_v57, %s1225_s0 }
0x162b   :  { %v896_v60 = vpop.permute.xlu1 %895 }
0x162c   :  { %v898_v61 = vmul.f32 %v1216_v47, %v896_v60 }
0x162e   :  { %v940_v55 = vrot.slane %v898_v61, %v1289_v32 }
0x162f   :  { %v908_v62 = vpop.permute.xlu1 %907 }
0x1630   :  { %941 = vrot.lane.b32.xlu0 %v940_v55, %s1223_s19  ;;  %v918_v2 = vsel %vm25_vm2, %v1364_v59, %v908_v62 }
0x1633   :  { %v911_v3 = vpop.permute.xlu1 %910 }
0x1634   :  { %v919_v5 = vsel %vm914_vm3, %v918_v2, %v911_v3 }
0x1635   :  { %v920_v8 = vsel %vm916_vm4, %v919_v5, %v898_v61 }
0x1636   :  { %v923_v0 = vcombine.low %v917_v6, %v920_v8 }
0x1637   :  { %v955_v32 = vpop.permute.xlu1 %954 }
0x1638   :  { %987 = vst.sshfl [vmem:[%s1416_s2] sm:$0x33 pattern:$0x76325410] %v923_v0  ;;  %957 = vst.msk [vmem:[#allocation3] sm:$0x3] %vm15_vm0, %v955_v32 }
0x16a2   :  { %v942_v4 = vpop.permute.xlu0 %941 }
0x16a3   :  { %945 = vst.msk [vmem:[#allocation2] sm:$0x3] %vm15_vm0, %v942_v4 }

</bundles_post_ra>
